<compile_context>
chip_gen: v7x
topology: tpu7x:2x2x1
jax: 0.10.0
libtpu: 0.0.40
codegen_flags: <defaults>
</compile_context>

<pallas_src>
import functools

import jax
import jax.numpy as jnp
from jax.experimental import pallas as pl
from jax.experimental.pallas import tpu as pltpu


_IM2COL_MAX_CIN = 128  # above this, use 9 accumulating dots (v7x VMEM budget)


def _gelu(x):
  # nn.GELU() default (exact, erf-based): x * 0.5 * (1 + erf(x / sqrt(2)))
  return x * 0.5 * (1.0 + jax.lax.erf(x * 0.7071067811865476))


# ---------------------------------------------------------------------------
# One-time backend micro-probes (tiny pallas_calls, cached per process).
# They guarantee correctness/compilability of the uncertain features without
# ever risking the main kernel: each has a safe fallback.
# ---------------------------------------------------------------------------
@functools.lru_cache(maxsize=None)
def _probe_roll_sign():
  """Sign convention of pltpu.roll on this backend.

  Returns s in {-1, +1} such that
    pltpu.roll(z, (s*off) % S, axis=-1)[..., i] == z[..., (i + off) % S],
  or 0 if pltpu.roll is unusable (the kernel then falls back to slice+concat).
  """
  def kern(x_ref, o_ref):
    o_ref[...] = pltpu.roll(x_ref[...], 1, axis=1)

  x = jnp.broadcast_to(jnp.arange(256, dtype=jnp.float32), (8, 256))
  try:
    y = pl.pallas_call(
        kern, out_shape=jax.ShapeDtypeStruct((8, 256), jnp.float32))(x)
    v = int(y[0, 0])
  except Exception:
    return 0
  if v == 255:      # jnp.roll convention: out[i] = in[i - shift]
    return -1
  if v == 1:        # opposite convention: out[i] = in[i + shift]
    return 1
  return 0


@functools.lru_cache(maxsize=None)
def _probe_single_buffer():
  """True if pipeline_mode=pl.Buffered(1) is accepted for invariant operands."""
  def kern(x_ref, o_ref):
    o_ref[...] = x_ref[...] + 1.0

  x = jnp.zeros((8, 128), jnp.float32)
  try:
    pl.pallas_call(
        kern,
        grid=(2,),
        in_specs=[pl.BlockSpec((8, 128), lambda i: (0, 0),
                               pipeline_mode=pl.Buffered(1))],
        out_specs=pl.BlockSpec((8, 128), lambda i: (i, 0)),
        out_shape=jax.ShapeDtypeStruct((16, 128), jnp.float32))(x)
    return True
  except Exception:
    return False


@functools.lru_cache(maxsize=None)
def _probe_core_parallel():
  """True on v7x-class chips where CORE_PARALLEL grid semantics compile."""
  try:
    kind = jax.devices()[0].device_kind.lower()
  except Exception:
    return False
  if "v7" not in kind:           # v5e/v6e: single TC, "parallel" is equivalent
    return False

  def kern(x_ref, o_ref):
    o_ref[...] = x_ref[...] + 1.0

  x = jnp.zeros((8, 128), jnp.float32)
  try:
    pl.pallas_call(
        kern,
        grid=(2,),
        in_specs=[pl.BlockSpec((8, 128), lambda i: (0, 0))],
        out_specs=pl.BlockSpec((8, 128), lambda i: (i, 0)),
        out_shape=jax.ShapeDtypeStruct((16, 128), jnp.float32),
        compiler_params=pltpu.CompilerParams(
            dimension_semantics=(pltpu.CORE_PARALLEL,)))(x)
    return True
  except Exception:
    return False


# ---------------------------------------------------------------------------
# In-kernel helpers.
# ---------------------------------------------------------------------------
def _roll_lanes(z, offset, roll_sign):
  """out[:, s] = z[:, (s + offset) % S]  (circular shift along the lane axis)."""
  S = z.shape[-1]
  off = offset % S
  if off == 0:
    return z
  if roll_sign != 0:
    return pltpu.roll(z, (roll_sign * offset) % S, axis=1)   # XLU rotate
  # Fallback (pltpu.roll unavailable): known-good two-slice concat.
  return jnp.concatenate([z[:, off:], z[:, :off]], axis=-1)


def _conv3x3_circular(a, w_mat, b, *, W, at_left, at_right, roll_sign):
  """3x3 conv with circular padding on channels-first flattened spatial data.

  a:       (Cin, S=H*W) f32, already activated, UNPADDED
  w_mat:   (Cout, 9*Cin) bf16, tap-major: k = (ty*3 + tx)*Cin + ci
  b:       (Cout, 1) f32
  at_left / at_right: (1, S) bool lane masks (col == 0 / col == W-1), hoisted.

  A flat lane roll by d*W (d = ty-1) is exactly circular in H (rows wrap
  mod S); the W direction needs a one-column fix at the row boundary.
  """
  Cin, S = a.shape
  left = jnp.where(at_left, _roll_lanes(a, W - 1, roll_sign),
                   _roll_lanes(a, -1, roll_sign))
  right = jnp.where(at_right, _roll_lanes(a, -(W - 1), roll_sign),
                    _roll_lanes(a, 1, roll_sign))
  cols = (left, a, right)                       # indexed by tx (kernel x tap)

  if Cin < _IM2COL_MAX_CIN:
    # im2col: one (Cout, 9*Cin) @ (9*Cin, S) MXU contraction, bf16 operands.
    parts = [_roll_lanes(cols[tx], (ty - 1) * W, roll_sign).astype(jnp.bfloat16)
             for ty in range(3) for tx in range(3)]
    xsh = jnp.concatenate(parts, axis=0)        # (9*Cin, S) bf16, lane-dense
    out = jnp.dot(w_mat, xsh, preferred_element_type=jnp.float32)
  else:
    # Realistic UNet widths: accumulate 9 shifted K=Cin dots instead of
    # materializing the 9x activation stack (bounds peak VMEM on v7x; K=Cin
    # already fills the MXU).
    out = None
    t = 0
    for ty in range(3):
      for tx in range(3):
        part = _roll_lanes(cols[tx], (ty - 1) * W, roll_sign).astype(jnp.bfloat16)
        d = jnp.dot(w_mat[:, t * Cin:(t + 1) * Cin], part,
                    preferred_element_type=jnp.float32)
        out = d if out is None else out + d
        t += 1
  return out + b


# ---------------------------------------------------------------------------
# Fused UpBlock kernel: ResidualBlock (+ AttentionBlock), `images` per step.
# ---------------------------------------------------------------------------
def _upblock_kernel(x_ref, embp_ref, w1_ref, w2_ref, ws_ref, bias_ref, *rest,
                    W, images, scale, has_attn, roll_sign):
  if has_attn:
    wqkv_ref, wo_ref, o_ref = rest
  else:
    (o_ref,) = rest

  cout = w1_ref.shape[0]
  S = x_ref.shape[-1]

  # Hoisted once per grid step: W-boundary lane masks, shared by both convs and
  # every image in this step (the iota % W pattern repeats every row).
  colw = jax.lax.broadcasted_iota(jnp.int32, (1, S), 1) % W
  at_left = colw == 0
  at_right = colw == (W - 1)

  w1 = w1_ref[...]          # (Cout, 9*Cin)  bf16
  w2 = w2_ref[...]          # (Cout, 9*Cout) bf16
  ws = ws_ref[...]          # (Cout, Cin)    bf16
  b1 = bias_ref[:, 0:1]
  b2 = bias_ref[:, 1:2]
  bs = bias_ref[:, 2:3]
  if has_attn:
    wqkv = wqkv_ref[...]    # (3*Cout, Cout) bf16
    wo = wo_ref[...]        # (Cout, Cout)   bf16
    bq = bias_ref[:, 3:4]
    bk = bias_ref[:, 4:5]
    bv = bias_ref[:, 5:6]
    bo = bias_ref[:, 6:7]

  for b in range(images):   # static unroll: `images` images per grid step
    x = x_ref[b]            # (Cin, S) f32, S on lanes

    # ---- ResidualBlock (norm = Identity, activation = exact GELU) ----
    h = _conv3x3_circular(_gelu(x), w1, b1, W=W, at_left=at_left,
                          at_right=at_right, roll_sign=roll_sign)
    h = h + embp_ref[b]     # conditioning projection (precomputed, (Cout, 1))
    h = _conv3x3_circular(_gelu(h), w2, b2, W=W, at_left=at_left,
                          at_right=at_right, roll_sign=roll_sign)
    y = h + jnp.dot(ws, x.astype(jnp.bfloat16),
                    preferred_element_type=jnp.float32) + bs     # 1x1 shortcut

    # ---- AttentionBlock (n_heads=1, d_k=C; GroupNorm unused in forward) ----
    if has_attn:
      yb = y.astype(jnp.bfloat16)
      qkv = jnp.dot(wqkv, yb, preferred_element_type=jnp.float32)   # (3C, S)
      q = ((qkv[:cout] + bq) * scale).astype(jnp.bfloat16)  # fold 1/sqrt(C) in
      k = (qkv[cout:2 * cout] + bk).astype(jnp.bfloat16)
      v = (qkv[2 * cout:] + bv).astype(jnp.bfloat16)
      # scores_t[j, i] = k_j . q_i (== torch attn[i, j]); softmax over the
      # QUERY index i (torch softmax(dim=1)) lands on the lane axis here.
      scores_t = jax.lax.dot_general(
          k, q, (((0,), (0,)), ((), ())),
          preferred_element_type=jnp.float32)                      # (S_j, S_i)
      m = jnp.max(scores_t, axis=1, keepdims=True)
      e = jnp.exp(scores_t - m)
      denom = jnp.sum(e, axis=1, keepdims=True)
      attn_t = e * pl.reciprocal(denom, approx=True)
      res = jnp.dot(v, attn_t.astype(jnp.bfloat16),
                    preferred_element_type=jnp.float32)            # (C, S_i)
      y = jnp.dot(wo, res.astype(jnp.bfloat16),
                  preferred_element_type=jnp.float32) + bo + y

    o_ref[b] = y.astype(o_ref.dtype)


# ---------------------------------------------------------------------------
# Parameter packing (kernel-ready, bf16 weights, consolidated biases).
# ---------------------------------------------------------------------------
def _pack_params(p, has_attn):
  def conv_mat(w):  # (Cout, Cin, 3, 3) torch OIHW -> (Cout, 9*Cin), tap-major
    cout, cin = w.shape[0], w.shape[1]
    return jnp.transpose(w, (0, 2, 3, 1)).reshape(cout, 9 * cin).astype(jnp.bfloat16)

  bias_cols = [p["conv1_b"], p["conv2_b"], p["shortcut_b"]]
  packed = dict(
      w1=conv_mat(p["conv1_w"]),
      w2=conv_mat(p["conv2_w"]),
      ws=p["shortcut_w"][:, :, 0, 0].astype(jnp.bfloat16),
  )
  if has_attn:
    c = p["conv1_w"].shape[0]
    bp = p["attn_proj_b"]                       # (3C,)
    bias_cols += [bp[:c], bp[c:2 * c], bp[2 * c:], p["attn_out_b"]]
    packed["wqkv"] = p["attn_proj_w"].astype(jnp.bfloat16)   # (3C, C)
    packed["wo"] = p["attn_out_w"].astype(jnp.bfloat16)      # (C, C)
  packed["bias"] = jnp.stack([c_.astype(jnp.float32) for c_ in bias_cols],
                             axis=1)            # (Cout, n_bias)
  return packed


def _pick_images_per_step(B, max_per_step=8):
  """Largest divisor of B (capped) that still leaves >= 2 grid steps.

  >= 2 steps lets both v7x TensorCores take work; batching several images per
  step amortizes the ~0.35us per-grid-step overhead on single-TC v5e/v6e.
  """
  if B < 2:
    return 1
  best = 1
  for bt in range(1, min(B, max_per_step) + 1):
    if B % bt == 0 and B // bt >= 2:
      best = bt
  return best


# ---------------------------------------------------------------------------
# Public forward.
# ---------------------------------------------------------------------------
def upblock_forward(params, x, emb, *, has_attn=True, images_per_step=None,
                    core_parallel=None):
  """x: (B, in_channels + out_channels, H, W) NCHW; emb: (B, cond). Returns NCHW."""
  B, cin, H, W = x.shape
  cout = params["conv1_w"].shape[0]
  S = H * W

  roll_sign = _probe_roll_sign()
  single_buf = _probe_single_buffer()
  if core_parallel is None:
    core_parallel = _probe_core_parallel()      # only True on v7x (2 TCs)

  if images_per_step is None:
    images_per_step = _pick_images_per_step(B)
  assert B % images_per_step == 0, (B, images_per_step)
  steps = B // images_per_step

  # Channels-first flattened layout (C, S): S on the lane axis; pure reshape.
  x_flat = x.astype(jnp.float32).reshape(B, cin, S)
  # Conditioning Linear precomputed here (tiny (B,cond)x(cond,Cout) GEMM);
  # in-kernel it was a VPU multiply + cross-lane XLU reduce per image.
  embp = (jnp.einsum("bc,oc->bo", emb.astype(jnp.float32), params["emb_w"],
                     precision=jax.lax.Precision.HIGHEST)
          + params["emb_b"]).reshape(B, cout, 1)

  packed = _pack_params(params, has_attn)
  names = ["w1", "w2", "ws", "bias"] + (["wqkv", "wo"] if has_attn else [])

  def param_spec(shape):
    nd = len(shape)
    idx = lambda *i, _nd=nd: (0,) * _nd
    if single_buf:   # grid-invariant weights: no point double-buffering them
      return pl.BlockSpec(shape, idx, pipeline_mode=pl.Buffered(1))
    return pl.BlockSpec(shape, idx)

  kern = functools.partial(
      _upblock_kernel, W=W, images=images_per_step,
      scale=float(cout) ** -0.5, has_attn=has_attn, roll_sign=roll_sign)

  dim_sem = ((pltpu.CORE_PARALLEL,) if core_parallel else ("parallel",))

  out = pl.pallas_call(
      kern,
      out_shape=jax.ShapeDtypeStruct((B, cout, S), jnp.float32),
      grid=(steps,),
      in_specs=[pl.BlockSpec((images_per_step, cin, S), lambda i: (i, 0, 0)),
                pl.BlockSpec((images_per_step, cout, 1), lambda i: (i, 0, 0))]
               + [param_spec(packed[n].shape) for n in names],
      out_specs=pl.BlockSpec((images_per_step, cout, S), lambda i: (i, 0, 0)),
      compiler_params=pltpu.CompilerParams(
          dimension_semantics=dim_sem,
          vmem_limit_bytes=64 * 1024 * 1024),
  )(x_flat, embp, *[packed[n] for n in names])
  return out.reshape(B, cout, H, W)


# ---------------------------------------------------------------------------
# Deterministic parameter init (shapes from the module's __init__, torch layout)
# ---------------------------------------------------------------------------
def init_params(key, in_channels, out_channels, cond_channels,
                has_attn=True, zero_init_conv2=False):
  cin = in_channels + out_channels   # UpBlock: ResidualBlock(in_c + out_c, out_c, ...)
  cout = out_channels

  def nrm(k, shape, s=0.15):
    return s * jax.random.normal(k, shape, jnp.float32)

  ks = jax.random.split(key, 12)
  p = dict(
      conv1_w=nrm(ks[0], (cout, cin, 3, 3)),
      conv1_b=nrm(ks[1], (cout,)),
      # zero_module(conv2) zeroes these at torch init; keep them non-zero here
      # so the conv2 compute path is actually exercised (semantics identical).
      conv2_w=(jnp.zeros((cout, cout, 3, 3), jnp.float32) if zero_init_conv2
               else nrm(ks[2], (cout, cout, 3, 3))),
      conv2_b=(jnp.zeros((cout,), jnp.float32) if zero_init_conv2
               else nrm(ks[3], (cout,))),
      shortcut_w=nrm(ks[4], (cout, cin, 1, 1)),
      shortcut_b=nrm(ks[5], (cout,)),
      emb_w=nrm(ks[6], (cout, cond_channels)),   # torch Linear weight (out, in)
      emb_b=nrm(ks[7], (cout,)),
  )
  if has_attn:
    p.update(
        attn_proj_w=nrm(ks[8], (3 * cout, cout)),
        attn_proj_b=nrm(ks[9], (3 * cout,)),
        attn_out_w=nrm(ks[10], (cout, cout)),
        attn_out_b=nrm(ks[11], (cout,)),
    )
  return p


# ---------------------------------------------------------------------------
# Pure-JAX reference (mirrors the PyTorch forward, HIGHEST precision).
# ---------------------------------------------------------------------------
def upblock_reference(params, x, emb, *, has_attn=True):
  P = jax.lax.Precision.HIGHEST
  x = x.astype(jnp.float32)
  emb = emb.astype(jnp.float32)
  B, _, H, W = x.shape
  gelu = lambda t: jax.nn.gelu(t, approximate=False)

  def conv3x3(z, w, b):
    zp = jnp.pad(z, ((0, 0), (0, 0), (1, 1), (1, 1)), mode="wrap")   # circular
    o = jax.lax.conv_general_dilated(
        zp, w, (1, 1), "VALID",
        dimension_numbers=("NCHW", "OIHW", "NCHW"), precision=P)
    return o + b[None, :, None, None]

  h = conv3x3(gelu(x), params["conv1_w"], params["conv1_b"])
  emb_out = jnp.einsum("bc,oc->bo", emb, params["emb_w"], precision=P) + params["emb_b"]
  h = h + emb_out[:, :, None, None]
  h = conv3x3(gelu(h), params["conv2_w"], params["conv2_b"])
  sc = jnp.einsum("oi,bihw->bohw", params["shortcut_w"][:, :, 0, 0], x,
                  precision=P) + params["shortcut_b"][None, :, None, None]
  y = h + sc
  if has_attn:
    C = y.shape[1]
    xf = y.reshape(B, C, H * W).transpose(0, 2, 1)                   # (B, S, C)
    qkv = jnp.einsum("bsc,oc->bso", xf, params["attn_proj_w"],
                     precision=P) + params["attn_proj_b"]
    q, k, v = jnp.split(qkv, 3, axis=-1)
    attn = jnp.einsum("bic,bjc->bij", q, k, precision=P) * (float(C) ** -0.5)
    attn = jax.nn.softmax(attn, axis=1)        # torch: softmax(dim=1), over query i
    res = jnp.einsum("bij,bjc->bic", attn, v, precision=P)
    res = jnp.einsum("bsc,oc->bso", res, params["attn_out_w"],
                     precision=P) + params["attn_out_b"] + xf
    y = res.transpose(0, 2, 1).reshape(B, C, H, W)
  return y


if __name__ == "__main__":
  B, IN_C, OUT_C, H, W, COND = 2, 4, 4, 16, 16, 32
  key = jax.random.PRNGKey(0)
  kx, ke, kp = jax.random.split(key, 3)
  # UpBlock input carries the concatenated skip connection: in_c + out_c channels.
  x = jax.random.normal(kx, (B, IN_C + OUT_C, H, W), jnp.float32)
  emb = jax.random.normal(ke, (B, COND), jnp.float32)
  params = init_params(kp, IN_C, OUT_C, COND, has_attn=True)

  # bf16 matmul operands: expected worst-case deviation from the f32-HIGHEST
  # reference is a few 1e-2 at O(1..5) output magnitudes (2^-8 operand rounding
  # compounded over a 4-matmul chain); structural/semantic bugs would give
  # errors of O(1..10).  Hence the 1e-1 absolute tolerance.
  TOL = 1e-1

  # has_attn=True path (ResidualBlock + AttentionBlock)
  fwd_attn = jax.jit(functools.partial(upblock_forward, has_attn=True))
  out = fwd_attn(params, x, emb)
  jax.block_until_ready(out)
  assert out.shape == (B, OUT_C, H, W), out.shape
  assert bool(jnp.all(jnp.isfinite(out)))
  ref = upblock_reference(params, x, emb, has_attn=True)
  err = float(jnp.max(jnp.abs(out - ref)))
  assert err < TOL, f"has_attn=True mismatch vs reference: {err}"

  # has_attn=False path (UpBlock default: attention is Identity)
  fwd_plain = jax.jit(functools.partial(upblock_forward, has_attn=False))
  out2 = fwd_plain(params, x, emb)
  jax.block_until_ready(out2)
  ref2 = upblock_reference(params, x, emb, has_attn=False)
  err2 = float(jnp.max(jnp.abs(out2 - ref2)))
  assert err2 < TOL, f"has_attn=False mismatch vs reference: {err2}"

  print("KERNEL_OK")
</pallas_src>

<mosaic_0001>
module attributes {stable_mosaic.version = 11 : i64} {
  func.func @_upblock_kernel(%arg0: i32, %arg1: memref<1x8x256xf32, #tpu.memory_space<vmem>>, %arg2: memref<1x4x1xf32, #tpu.memory_space<vmem>>, %arg3: memref<4x72xbf16, #tpu.memory_space<vmem>>, %arg4: memref<4x36xbf16, #tpu.memory_space<vmem>>, %arg5: memref<4x8xbf16, #tpu.memory_space<vmem>>, %arg6: memref<4x7xf32, #tpu.memory_space<vmem>>, %arg7: memref<12x4xbf16, #tpu.memory_space<vmem>>, %arg8: memref<4x4xbf16, #tpu.memory_space<vmem>>, %arg9: memref<1x4x256xf32, #tpu.memory_space<vmem>>) attributes {dimension_semantics = [#tpu.dimension_semantics<parallel>], iteration_bounds = array<i64: 2>, scalar_prefetch = 0 : i64, scratch_operands = 0 : i64, tpu.core_type = #tpu.core_type<tc>, window_params = [{transform_indices = @transform_0, window_bounds = array<i64: 1, 8, 256>}, {transform_indices = @transform_1, window_bounds = array<i64: 1, 4, 1>}, {pipeline_mode = #tpu.pipeline_mode<synchronous>, transform_indices = @transform_2, window_bounds = array<i64: 4, 72>}, {pipeline_mode = #tpu.pipeline_mode<synchronous>, transform_indices = @transform_3, window_bounds = array<i64: 4, 36>}, {pipeline_mode = #tpu.pipeline_mode<synchronous>, transform_indices = @transform_4, window_bounds = array<i64: 4, 8>}, {pipeline_mode = #tpu.pipeline_mode<synchronous>, transform_indices = @transform_5, window_bounds = array<i64: 4, 7>}, {pipeline_mode = #tpu.pipeline_mode<synchronous>, transform_indices = @transform_6, window_bounds = array<i64: 12, 4>}, {pipeline_mode = #tpu.pipeline_mode<synchronous>, transform_indices = @transform_7, window_bounds = array<i64: 4, 4>}, {transform_indices = @transform_8, window_bounds = array<i64: 1, 4, 256>}]} {
    %0 = tpu.iota {dimensions = array<i32: 1>} : vector<1x256xi32>
    %c16_i32 = arith.constant 16 : i32
    %c0_i32 = arith.constant 0 : i32
    %1 = arith.cmpi eq, %c16_i32, %c0_i32 : i32
    %c1_i32 = arith.constant 1 : i32
    %2 = arith.select %1, %c1_i32, %c16_i32 : i32
    %3 = vector.broadcast %2 : i32 to vector<1x256xi32>
    %4 = arith.remsi %0, %3 : vector<1x256xi32>
    %c0_i32_0 = arith.constant 0 : i32
    %5 = vector.broadcast %c0_i32_0 : i32 to vector<1x256xi32>
    %6 = arith.cmpi ne, %4, %5 : vector<1x256xi32>
    %c0_i32_1 = arith.constant 0 : i32
    %7 = vector.broadcast %c0_i32_1 : i32 to vector<1x256xi32>
    %8 = arith.cmpi slt, %4, %7 : vector<1x256xi32>
    %c0_i32_2 = arith.constant 0 : i32
    %9 = arith.cmpi slt, %2, %c0_i32_2 : i32
    %10 = vector.broadcast %9 : i1 to vector<1x256xi1>
    %11 = vector.broadcast %10 : vector<1x256xi1> to vector<1x256xi1>
    %12 = arith.xori %8, %11 : vector<1x256xi1>
    %13 = arith.andi %12, %6 : vector<1x256xi1>
    %14 = vector.broadcast %2 : i32 to vector<1x256xi32>
    %15 = arith.addi %4, %14 : vector<1x256xi32>
    %16 = arith.select %13, %15, %4 : vector<1x256xi1>, vector<1x256xi32>
    %c0_i32_3 = arith.constant 0 : i32
    %17 = vector.broadcast %c0_i32_3 : i32 to vector<1x256xi32>
    %18 = arith.cmpi eq, %16, %17 : vector<1x256xi32>
    %c15_i32 = arith.constant 15 : i32
    %19 = vector.broadcast %c15_i32 : i32 to vector<1x256xi32>
    %20 = arith.cmpi eq, %16, %19 : vector<1x256xi32>
    %c0 = arith.constant 0 : index
    %c0_4 = arith.constant 0 : index
    %21 = vector.load %arg3[%c0, %c0_4] : memref<4x72xbf16, #tpu.memory_space<vmem>>, vector<4x72xbf16>
    %c0_5 = arith.constant 0 : index
    %c0_6 = arith.constant 0 : index
    %22 = vector.load %arg4[%c0_5, %c0_6] : memref<4x36xbf16, #tpu.memory_space<vmem>>, vector<4x36xbf16>
    %c0_7 = arith.constant 0 : index
    %c0_8 = arith.constant 0 : index
    %23 = vector.load %arg5[%c0_7, %c0_8] : memref<4x8xbf16, #tpu.memory_space<vmem>>, vector<4x8xbf16>
    %c0_9 = arith.constant 0 : index
    %c0_10 = arith.constant 0 : index
    %24 = vector.load %arg6[%c0_9, %c0_10] : memref<4x7xf32, #tpu.memory_space<vmem>>, vector<4x1xf32>
    %c0_11 = arith.constant 0 : index
    %c1 = arith.constant 1 : index
    %25 = vector.load %arg6[%c0_11, %c1] : memref<4x7xf32, #tpu.memory_space<vmem>>, vector<4x1xf32>
    %c0_12 = arith.constant 0 : index
    %c2 = arith.constant 2 : index
    %26 = vector.load %arg6[%c0_12, %c2] : memref<4x7xf32, #tpu.memory_space<vmem>>, vector<4x1xf32>
    %c0_13 = arith.constant 0 : index
    %c0_14 = arith.constant 0 : index
    %27 = vector.load %arg7[%c0_13, %c0_14] : memref<12x4xbf16, #tpu.memory_space<vmem>>, vector<12x4xbf16>
    %c0_15 = arith.constant 0 : index
    %c0_16 = arith.constant 0 : index
    %28 = vector.load %arg8[%c0_15, %c0_16] : memref<4x4xbf16, #tpu.memory_space<vmem>>, vector<4x4xbf16>
    %c0_17 = arith.constant 0 : index
    %c3 = arith.constant 3 : index
    %29 = vector.load %arg6[%c0_17, %c3] : memref<4x7xf32, #tpu.memory_space<vmem>>, vector<4x1xf32>
    %c0_18 = arith.constant 0 : index
    %c4 = arith.constant 4 : index
    %30 = vector.load %arg6[%c0_18, %c4] : memref<4x7xf32, #tpu.memory_space<vmem>>, vector<4x1xf32>
    %c0_19 = arith.constant 0 : index
    %c5 = arith.constant 5 : index
    %31 = vector.load %arg6[%c0_19, %c5] : memref<4x7xf32, #tpu.memory_space<vmem>>, vector<4x1xf32>
    %c0_20 = arith.constant 0 : index
    %c6 = arith.constant 6 : index
    %32 = vector.load %arg6[%c0_20, %c6] : memref<4x7xf32, #tpu.memory_space<vmem>>, vector<4x1xf32>
    %c0_21 = arith.constant 0 : index
    %c0_22 = arith.constant 0 : index
    %c0_23 = arith.constant 0 : index
    %33 = vector.load %arg1[%c0_21, %c0_22, %c0_23] : memref<1x8x256xf32, #tpu.memory_space<vmem>>, vector<1x8x256xf32>
    %34 = vector.shape_cast %33 : vector<1x8x256xf32> to vector<8x256xf32>
    %cst = arith.constant 5.000000e-01 : f32
    %35 = vector.broadcast %cst : f32 to vector<8x256xf32>
    %36 = arith.mulf %34, %35 : vector<8x256xf32>
    %cst_24 = arith.constant 0.707106769 : f32
    %37 = vector.broadcast %cst_24 : f32 to vector<8x256xf32>
    %38 = arith.mulf %34, %37 : vector<8x256xf32>
    %39 = math.erf %38 : vector<8x256xf32>
    %cst_25 = arith.constant 1.000000e+00 : f32
    %40 = vector.broadcast %cst_25 : f32 to vector<8x256xf32>
    %41 = arith.addf %40, %39 : vector<8x256xf32>
    %42 = arith.mulf %36, %41 : vector<8x256xf32>
    %43 = vector.extract_strided_slice %42 {offsets = [0, 15], sizes = [8, 241], strides = [1, 1]} : vector<8x256xf32> to vector<8x241xf32>
    %44 = vector.extract_strided_slice %42 {offsets = [0, 0], sizes = [8, 15], strides = [1, 1]} : vector<8x256xf32> to vector<8x15xf32>
    %45 = tpu.concatenate %43, %44 in 1 : vector<8x241xf32>, vector<8x15xf32> -> vector<8x256xf32>
    %46 = vector.extract_strided_slice %42 {offsets = [0, 255], sizes = [8, 1], strides = [1, 1]} : vector<8x256xf32> to vector<8x1xf32>
    %47 = vector.extract_strided_slice %42 {offsets = [0, 0], sizes = [8, 255], strides = [1, 1]} : vector<8x256xf32> to vector<8x255xf32>
    %48 = tpu.concatenate %46, %47 in 1 : vector<8x1xf32>, vector<8x255xf32> -> vector<8x256xf32>
    %49 = vector.shape_cast %18 : vector<1x256xi1> to vector<1x256xi1>
    %50 = vector.broadcast %49 : vector<1x256xi1> to vector<8x256xi1>
    %51 = arith.select %50, %45, %48 : vector<8x256xi1>, vector<8x256xf32>
    %52 = vector.extract_strided_slice %42 {offsets = [0, 241], sizes = [8, 15], strides = [1, 1]} : vector<8x256xf32> to vector<8x15xf32>
    %53 = vector.extract_strided_slice %42 {offsets = [0, 0], sizes = [8, 241], strides = [1, 1]} : vector<8x256xf32> to vector<8x241xf32>
    %54 = tpu.concatenate %52, %53 in 1 : vector<8x15xf32>, vector<8x241xf32> -> vector<8x256xf32>
    %55 = vector.extract_strided_slice %42 {offsets = [0, 1], sizes = [8, 255], strides = [1, 1]} : vector<8x256xf32> to vector<8x255xf32>
    %56 = vector.extract_strided_slice %42 {offsets = [0, 0], sizes = [8, 1], strides = [1, 1]} : vector<8x256xf32> to vector<8x1xf32>
    %57 = tpu.concatenate %55, %56 in 1 : vector<8x255xf32>, vector<8x1xf32> -> vector<8x256xf32>
    %58 = vector.shape_cast %20 : vector<1x256xi1> to vector<1x256xi1>
    %59 = vector.broadcast %58 : vector<1x256xi1> to vector<8x256xi1>
    %60 = arith.select %59, %54, %57 : vector<8x256xi1>, vector<8x256xf32>
    %61 = vector.extract_strided_slice %51 {offsets = [0, 240], sizes = [8, 16], strides = [1, 1]} : vector<8x256xf32> to vector<8x16xf32>
    %62 = vector.extract_strided_slice %51 {offsets = [0, 0], sizes = [8, 240], strides = [1, 1]} : vector<8x256xf32> to vector<8x240xf32>
    %63 = tpu.concatenate %61, %62 in 1 : vector<8x16xf32>, vector<8x240xf32> -> vector<8x256xf32>
    %64 = arith.truncf %63 : vector<8x256xf32> to vector<8x256xbf16>
    %65 = vector.extract_strided_slice %42 {offsets = [0, 240], sizes = [8, 16], strides = [1, 1]} : vector<8x256xf32> to vector<8x16xf32>
    %66 = vector.extract_strided_slice %42 {offsets = [0, 0], sizes = [8, 240], strides = [1, 1]} : vector<8x256xf32> to vector<8x240xf32>
    %67 = tpu.concatenate %65, %66 in 1 : vector<8x16xf32>, vector<8x240xf32> -> vector<8x256xf32>
    %68 = arith.truncf %67 : vector<8x256xf32> to vector<8x256xbf16>
    %69 = vector.extract_strided_slice %60 {offsets = [0, 240], sizes = [8, 16], strides = [1, 1]} : vector<8x256xf32> to vector<8x16xf32>
    %70 = vector.extract_strided_slice %60 {offsets = [0, 0], sizes = [8, 240], strides = [1, 1]} : vector<8x256xf32> to vector<8x240xf32>
    %71 = tpu.concatenate %69, %70 in 1 : vector<8x16xf32>, vector<8x240xf32> -> vector<8x256xf32>
    %72 = arith.truncf %71 : vector<8x256xf32> to vector<8x256xbf16>
    %73 = arith.truncf %51 : vector<8x256xf32> to vector<8x256xbf16>
    %74 = arith.truncf %42 : vector<8x256xf32> to vector<8x256xbf16>
    %75 = arith.truncf %60 : vector<8x256xf32> to vector<8x256xbf16>
    %76 = vector.extract_strided_slice %51 {offsets = [0, 16], sizes = [8, 240], strides = [1, 1]} : vector<8x256xf32> to vector<8x240xf32>
    %77 = vector.extract_strided_slice %51 {offsets = [0, 0], sizes = [8, 16], strides = [1, 1]} : vector<8x256xf32> to vector<8x16xf32>
    %78 = tpu.concatenate %76, %77 in 1 : vector<8x240xf32>, vector<8x16xf32> -> vector<8x256xf32>
    %79 = arith.truncf %78 : vector<8x256xf32> to vector<8x256xbf16>
    %80 = vector.extract_strided_slice %42 {offsets = [0, 16], sizes = [8, 240], strides = [1, 1]} : vector<8x256xf32> to vector<8x240xf32>
    %81 = vector.extract_strided_slice %42 {offsets = [0, 0], sizes = [8, 16], strides = [1, 1]} : vector<8x256xf32> to vector<8x16xf32>
    %82 = tpu.concatenate %80, %81 in 1 : vector<8x240xf32>, vector<8x16xf32> -> vector<8x256xf32>
    %83 = arith.truncf %82 : vector<8x256xf32> to vector<8x256xbf16>
    %84 = vector.extract_strided_slice %60 {offsets = [0, 16], sizes = [8, 240], strides = [1, 1]} : vector<8x256xf32> to vector<8x240xf32>
    %85 = vector.extract_strided_slice %60 {offsets = [0, 0], sizes = [8, 16], strides = [1, 1]} : vector<8x256xf32> to vector<8x16xf32>
    %86 = tpu.concatenate %84, %85 in 1 : vector<8x240xf32>, vector<8x16xf32> -> vector<8x256xf32>
    %87 = arith.truncf %86 : vector<8x256xf32> to vector<8x256xbf16>
    %88 = tpu.concatenate %64, %68, %72, %73, %74, %75, %79, %83, %87 in 0 : vector<8x256xbf16>, vector<8x256xbf16>, vector<8x256xbf16>, vector<8x256xbf16>, vector<8x256xbf16>, vector<8x256xbf16>, vector<8x256xbf16>, vector<8x256xbf16>, vector<8x256xbf16> -> vector<72x256xbf16>
    %cst_26 = arith.constant dense<0.000000e+00> : vector<4x256xf32>
    %89 = tpu.matmul %21, %88, %cst_26 {dimension_numbers = #tpu.dot_dimension_numbers<[1], [0], [0], [1], [0, 0, 1, 1], [], []>} : vector<4x72xbf16>, vector<72x256xbf16>, vector<4x256xf32> -> vector<4x256xf32>
    %90 = vector.broadcast %24 : vector<4x1xf32> to vector<4x256xf32>
    %91 = arith.addf %89, %90 : vector<4x256xf32>
    %c0_27 = arith.constant 0 : index
    %c0_28 = arith.constant 0 : index
    %c0_29 = arith.constant 0 : index
    %92 = vector.load %arg2[%c0_27, %c0_28, %c0_29] : memref<1x4x1xf32, #tpu.memory_space<vmem>>, vector<1x4x1xf32>
    %93 = vector.shape_cast %92 : vector<1x4x1xf32> to vector<4x1xf32>
    %94 = vector.broadcast %93 : vector<4x1xf32> to vector<4x256xf32>
    %95 = arith.addf %91, %94 : vector<4x256xf32>
    %cst_30 = arith.constant 5.000000e-01 : f32
    %96 = vector.broadcast %cst_30 : f32 to vector<4x256xf32>
    %97 = arith.mulf %95, %96 : vector<4x256xf32>
    %cst_31 = arith.constant 0.707106769 : f32
    %98 = vector.broadcast %cst_31 : f32 to vector<4x256xf32>
    %99 = arith.mulf %95, %98 : vector<4x256xf32>
    %100 = math.erf %99 : vector<4x256xf32>
    %cst_32 = arith.constant 1.000000e+00 : f32
    %101 = vector.broadcast %cst_32 : f32 to vector<4x256xf32>
    %102 = arith.addf %101, %100 : vector<4x256xf32>
    %103 = arith.mulf %97, %102 : vector<4x256xf32>
    %104 = vector.extract_strided_slice %103 {offsets = [0, 15], sizes = [4, 241], strides = [1, 1]} : vector<4x256xf32> to vector<4x241xf32>
    %105 = vector.extract_strided_slice %103 {offsets = [0, 0], sizes = [4, 15], strides = [1, 1]} : vector<4x256xf32> to vector<4x15xf32>
    %106 = tpu.concatenate %104, %105 in 1 : vector<4x241xf32>, vector<4x15xf32> -> vector<4x256xf32>
    %107 = vector.extract_strided_slice %103 {offsets = [0, 255], sizes = [4, 1], strides = [1, 1]} : vector<4x256xf32> to vector<4x1xf32>
    %108 = vector.extract_strided_slice %103 {offsets = [0, 0], sizes = [4, 255], strides = [1, 1]} : vector<4x256xf32> to vector<4x255xf32>
    %109 = tpu.concatenate %107, %108 in 1 : vector<4x1xf32>, vector<4x255xf32> -> vector<4x256xf32>
    %110 = vector.shape_cast %18 : vector<1x256xi1> to vector<1x256xi1>
    %111 = vector.broadcast %110 : vector<1x256xi1> to vector<4x256xi1>
    %112 = arith.select %111, %106, %109 : vector<4x256xi1>, vector<4x256xf32>
    %113 = vector.extract_strided_slice %103 {offsets = [0, 241], sizes = [4, 15], strides = [1, 1]} : vector<4x256xf32> to vector<4x15xf32>
    %114 = vector.extract_strided_slice %103 {offsets = [0, 0], sizes = [4, 241], strides = [1, 1]} : vector<4x256xf32> to vector<4x241xf32>
    %115 = tpu.concatenate %113, %114 in 1 : vector<4x15xf32>, vector<4x241xf32> -> vector<4x256xf32>
    %116 = vector.extract_strided_slice %103 {offsets = [0, 1], sizes = [4, 255], strides = [1, 1]} : vector<4x256xf32> to vector<4x255xf32>
    %117 = vector.extract_strided_slice %103 {offsets = [0, 0], sizes = [4, 1], strides = [1, 1]} : vector<4x256xf32> to vector<4x1xf32>
    %118 = tpu.concatenate %116, %117 in 1 : vector<4x255xf32>, vector<4x1xf32> -> vector<4x256xf32>
    %119 = vector.shape_cast %20 : vector<1x256xi1> to vector<1x256xi1>
    %120 = vector.broadcast %119 : vector<1x256xi1> to vector<4x256xi1>
    %121 = arith.select %120, %115, %118 : vector<4x256xi1>, vector<4x256xf32>
    %122 = vector.extract_strided_slice %112 {offsets = [0, 240], sizes = [4, 16], strides = [1, 1]} : vector<4x256xf32> to vector<4x16xf32>
    %123 = vector.extract_strided_slice %112 {offsets = [0, 0], sizes = [4, 240], strides = [1, 1]} : vector<4x256xf32> to vector<4x240xf32>
    %124 = tpu.concatenate %122, %123 in 1 : vector<4x16xf32>, vector<4x240xf32> -> vector<4x256xf32>
    %125 = arith.truncf %124 : vector<4x256xf32> to vector<4x256xbf16>
    %126 = vector.extract_strided_slice %103 {offsets = [0, 240], sizes = [4, 16], strides = [1, 1]} : vector<4x256xf32> to vector<4x16xf32>
    %127 = vector.extract_strided_slice %103 {offsets = [0, 0], sizes = [4, 240], strides = [1, 1]} : vector<4x256xf32> to vector<4x240xf32>
    %128 = tpu.concatenate %126, %127 in 1 : vector<4x16xf32>, vector<4x240xf32> -> vector<4x256xf32>
    %129 = arith.truncf %128 : vector<4x256xf32> to vector<4x256xbf16>
    %130 = vector.extract_strided_slice %121 {offsets = [0, 240], sizes = [4, 16], strides = [1, 1]} : vector<4x256xf32> to vector<4x16xf32>
    %131 = vector.extract_strided_slice %121 {offsets = [0, 0], sizes = [4, 240], strides = [1, 1]} : vector<4x256xf32> to vector<4x240xf32>
    %132 = tpu.concatenate %130, %131 in 1 : vector<4x16xf32>, vector<4x240xf32> -> vector<4x256xf32>
    %133 = arith.truncf %132 : vector<4x256xf32> to vector<4x256xbf16>
    %134 = arith.truncf %112 : vector<4x256xf32> to vector<4x256xbf16>
    %135 = arith.truncf %103 : vector<4x256xf32> to vector<4x256xbf16>
    %136 = arith.truncf %121 : vector<4x256xf32> to vector<4x256xbf16>
    %137 = vector.extract_strided_slice %112 {offsets = [0, 16], sizes = [4, 240], strides = [1, 1]} : vector<4x256xf32> to vector<4x240xf32>
    %138 = vector.extract_strided_slice %112 {offsets = [0, 0], sizes = [4, 16], strides = [1, 1]} : vector<4x256xf32> to vector<4x16xf32>
    %139 = tpu.concatenate %137, %138 in 1 : vector<4x240xf32>, vector<4x16xf32> -> vector<4x256xf32>
    %140 = arith.truncf %139 : vector<4x256xf32> to vector<4x256xbf16>
    %141 = vector.extract_strided_slice %103 {offsets = [0, 16], sizes = [4, 240], strides = [1, 1]} : vector<4x256xf32> to vector<4x240xf32>
    %142 = vector.extract_strided_slice %103 {offsets = [0, 0], sizes = [4, 16], strides = [1, 1]} : vector<4x256xf32> to vector<4x16xf32>
    %143 = tpu.concatenate %141, %142 in 1 : vector<4x240xf32>, vector<4x16xf32> -> vector<4x256xf32>
    %144 = arith.truncf %143 : vector<4x256xf32> to vector<4x256xbf16>
    %145 = vector.extract_strided_slice %121 {offsets = [0, 16], sizes = [4, 240], strides = [1, 1]} : vector<4x256xf32> to vector<4x240xf32>
    %146 = vector.extract_strided_slice %121 {offsets = [0, 0], sizes = [4, 16], strides = [1, 1]} : vector<4x256xf32> to vector<4x16xf32>
    %147 = tpu.concatenate %145, %146 in 1 : vector<4x240xf32>, vector<4x16xf32> -> vector<4x256xf32>
    %148 = arith.truncf %147 : vector<4x256xf32> to vector<4x256xbf16>
    %149 = tpu.concatenate %125, %129, %133, %134, %135, %136, %140, %144, %148 in 0 : vector<4x256xbf16>, vector<4x256xbf16>, vector<4x256xbf16>, vector<4x256xbf16>, vector<4x256xbf16>, vector<4x256xbf16>, vector<4x256xbf16>, vector<4x256xbf16>, vector<4x256xbf16> -> vector<36x256xbf16>
    %cst_33 = arith.constant dense<0.000000e+00> : vector<4x256xf32>
    %150 = tpu.matmul %22, %149, %cst_33 {dimension_numbers = #tpu.dot_dimension_numbers<[1], [0], [0], [1], [0, 0, 1, 1], [], []>} : vector<4x36xbf16>, vector<36x256xbf16>, vector<4x256xf32> -> vector<4x256xf32>
    %151 = vector.broadcast %25 : vector<4x1xf32> to vector<4x256xf32>
    %152 = arith.addf %150, %151 : vector<4x256xf32>
    %153 = arith.truncf %34 : vector<8x256xf32> to vector<8x256xbf16>
    %cst_34 = arith.constant dense<0.000000e+00> : vector<4x256xf32>
    %154 = tpu.matmul %23, %153, %cst_34 {dimension_numbers = #tpu.dot_dimension_numbers<[1], [0], [0], [1], [0, 0, 1, 1], [], []>} : vector<4x8xbf16>, vector<8x256xbf16>, vector<4x256xf32> -> vector<4x256xf32>
    %155 = arith.addf %152, %154 : vector<4x256xf32>
    %156 = vector.broadcast %26 : vector<4x1xf32> to vector<4x256xf32>
    %157 = arith.addf %155, %156 : vector<4x256xf32>
    %158 = arith.truncf %157 : vector<4x256xf32> to vector<4x256xbf16>
    %cst_35 = arith.constant dense<0.000000e+00> : vector<12x256xf32>
    %159 = tpu.matmul %27, %158, %cst_35 {dimension_numbers = #tpu.dot_dimension_numbers<[1], [0], [0], [1], [0, 0, 1, 1], [], []>} : vector<12x4xbf16>, vector<4x256xbf16>, vector<12x256xf32> -> vector<12x256xf32>
    %160 = vector.extract_strided_slice %159 {offsets = [0, 0], sizes = [4, 256], strides = [1, 1]} : vector<12x256xf32> to vector<4x256xf32>
    %161 = vector.broadcast %29 : vector<4x1xf32> to vector<4x256xf32>
    %162 = arith.addf %160, %161 : vector<4x256xf32>
    %cst_36 = arith.constant 5.000000e-01 : f32
    %163 = vector.broadcast %cst_36 : f32 to vector<4x256xf32>
    %164 = arith.mulf %162, %163 : vector<4x256xf32>
    %165 = arith.truncf %164 : vector<4x256xf32> to vector<4x256xbf16>
    %166 = vector.extract_strided_slice %159 {offsets = [4, 0], sizes = [4, 256], strides = [1, 1]} : vector<12x256xf32> to vector<4x256xf32>
    %167 = vector.broadcast %30 : vector<4x1xf32> to vector<4x256xf32>
    %168 = arith.addf %166, %167 : vector<4x256xf32>
    %169 = arith.truncf %168 : vector<4x256xf32> to vector<4x256xbf16>
    %170 = vector.extract_strided_slice %159 {offsets = [8, 0], sizes = [4, 256], strides = [1, 1]} : vector<12x256xf32> to vector<4x256xf32>
    %171 = vector.broadcast %31 : vector<4x1xf32> to vector<4x256xf32>
    %172 = arith.addf %170, %171 : vector<4x256xf32>
    %173 = arith.truncf %172 : vector<4x256xf32> to vector<4x256xbf16>
    %cst_37 = arith.constant dense<0.000000e+00> : vector<256x256xf32>
    %174 = tpu.matmul %169, %165, %cst_37 {dimension_numbers = #tpu.dot_dimension_numbers<[0], [0], [1], [1], [0, 1, 1, 1], [], []>} : vector<4x256xbf16>, vector<4x256xbf16>, vector<256x256xf32> -> vector<256x256xf32>
    %cst_38 = arith.constant dense<0xFF800000> : vector<256xf32>
    %175 = vector.multi_reduction <maximumf>, %174, %cst_38 [1] : vector<256x256xf32> to vector<256xf32>
    %176 = vector.shape_cast %175 : vector<256xf32> to vector<256x1xf32>
    %177 = vector.broadcast %176 : vector<256x1xf32> to vector<256x256xf32>
    %178 = arith.subf %174, %177 : vector<256x256xf32>
    %179 = math.exp %178 : vector<256x256xf32>
    %cst_39 = arith.constant dense<0.000000e+00> : vector<256xf32>
    %180 = vector.multi_reduction <add>, %179, %cst_39 [1] : vector<256x256xf32> to vector<256xf32>
    %181 = vector.shape_cast %180 : vector<256xf32> to vector<256x1xf32>
    %182 = tpu.reciprocal %181 {approx = true} : vector<256x1xf32> -> vector<256x1xf32>
    %183 = vector.broadcast %182 : vector<256x1xf32> to vector<256x256xf32>
    %184 = arith.mulf %179, %183 : vector<256x256xf32>
    %185 = arith.truncf %184 : vector<256x256xf32> to vector<256x256xbf16>
    %cst_40 = arith.constant dense<0.000000e+00> : vector<4x256xf32>
    %186 = tpu.matmul %173, %185, %cst_40 {dimension_numbers = #tpu.dot_dimension_numbers<[1], [0], [0], [1], [0, 0, 1, 1], [], []>} : vector<4x256xbf16>, vector<256x256xbf16>, vector<4x256xf32> -> vector<4x256xf32>
    %187 = arith.truncf %186 : vector<4x256xf32> to vector<4x256xbf16>
    %cst_41 = arith.constant dense<0.000000e+00> : vector<4x256xf32>
    %188 = tpu.matmul %28, %187, %cst_41 {dimension_numbers = #tpu.dot_dimension_numbers<[1], [0], [0], [1], [0, 0, 1, 1], [], []>} : vector<4x4xbf16>, vector<4x256xbf16>, vector<4x256xf32> -> vector<4x256xf32>
    %189 = vector.broadcast %32 : vector<4x1xf32> to vector<4x256xf32>
    %190 = arith.addf %188, %189 : vector<4x256xf32>
    %191 = arith.addf %190, %157 : vector<4x256xf32>
    %c0_42 = arith.constant 0 : index
    %c0_43 = arith.constant 0 : index
    %c0_44 = arith.constant 0 : index
    %192 = vector.load %arg9[%c0_42, %c0_43, %c0_44] : memref<1x4x256xf32, #tpu.memory_space<vmem>>, vector<1x4x256xf32>
    %193 = vector.shape_cast %192 : vector<1x4x256xf32> to vector<4x256xf32>
    %194 = vector.shape_cast %191 : vector<4x256xf32> to vector<1x4x256xf32>
    tpu.vector_store %arg9[%c0_42, %c0_43, %c0_44], %194 {strides = array<i32>} : memref<1x4x256xf32, #tpu.memory_space<vmem>>, vector<1x4x256xf32>,
    return
  }
  func.func @transform_0(%arg0: i32) -> (i32, i32, i32) {
    %c0_i32 = arith.constant 0 : i32
    %c0_i32_0 = arith.constant 0 : i32
    %c0_i32_1 = arith.constant 0 : i32
    return %arg0, %c0_i32, %c0_i32_0 : i32, i32, i32
  }
  func.func @transform_1(%arg0: i32) -> (i32, i32, i32) {
    %c0_i32 = arith.constant 0 : i32
    %c0_i32_0 = arith.constant 0 : i32
    %c0_i32_1 = arith.constant 0 : i32
    return %arg0, %c0_i32, %c0_i32_0 : i32, i32, i32
  }
  func.func @transform_2(%arg0: i32) -> (i32, i32) {
    %c0_i32 = arith.constant 0 : i32
    %c0_i32_0 = arith.constant 0 : i32
    %c0_i32_1 = arith.constant 0 : i32
    return %c0_i32, %c0_i32_0 : i32, i32
  }
  func.func @transform_3(%arg0: i32) -> (i32, i32) {
    %c0_i32 = arith.constant 0 : i32
    %c0_i32_0 = arith.constant 0 : i32
    %c0_i32_1 = arith.constant 0 : i32
    return %c0_i32, %c0_i32_0 : i32, i32
  }
  func.func @transform_4(%arg0: i32) -> (i32, i32) {
    %c0_i32 = arith.constant 0 : i32
    %c0_i32_0 = arith.constant 0 : i32
    %c0_i32_1 = arith.constant 0 : i32
    return %c0_i32, %c0_i32_0 : i32, i32
  }
  func.func @transform_5(%arg0: i32) -> (i32, i32) {
    %c0_i32 = arith.constant 0 : i32
    %c0_i32_0 = arith.constant 0 : i32
    %c0_i32_1 = arith.constant 0 : i32
    return %c0_i32, %c0_i32_0 : i32, i32
  }
  func.func @transform_6(%arg0: i32) -> (i32, i32) {
    %c0_i32 = arith.constant 0 : i32
    %c0_i32_0 = arith.constant 0 : i32
    %c0_i32_1 = arith.constant 0 : i32
    return %c0_i32, %c0_i32_0 : i32, i32
  }
  func.func @transform_7(%arg0: i32) -> (i32, i32) {
    %c0_i32 = arith.constant 0 : i32
    %c0_i32_0 = arith.constant 0 : i32
    %c0_i32_1 = arith.constant 0 : i32
    return %c0_i32, %c0_i32_0 : i32, i32
  }
  func.func @transform_8(%arg0: i32) -> (i32, i32, i32) {
    %c0_i32 = arith.constant 0 : i32
    %c0_i32_0 = arith.constant 0 : i32
    %c0_i32_1 = arith.constant 0 : i32
    return %arg0, %c0_i32, %c0_i32_0 : i32, i32, i32
  }
}

</mosaic_0001>

<bundles_post_ra>
// kernel: upblock_forward.1
= control target key start
LH: loop header
LB: loop body
LE: loop exit
PB: predicated region body
PF: predicated region fallthrough
CT: control target
= control target key end

     0   :  { %s4192_s0 = inlined_call_operand.hbm [shape: f32[2,8,256], index: 0, kind: input, shape index: {}]   ;;  %s4193_s1 = inlined_call_operand.hbm [shape: f32[2,4,1], index: 1, kind: input, shape index: {}]   ;;  %s4194_s2 = inlined_call_operand.hbm [shape: bf16[4,72], index: 2, kind: input, shape index: {}]   ;;  %s4195_s3 = inlined_call_operand.hbm [shape: bf16[4,36], index: 3, kind: input, shape index: {}]   ;;  %s4196_s4 = inlined_call_operand.hbm [shape: bf16[4,8], index: 4, kind: input, shape index: {}]   ;;  %s4197_s5 = inlined_call_operand.hbm [shape: f32[4,7], index: 5, kind: input, shape index: {}]   ;;  %s4198_s6 = inlined_call_operand.hbm [shape: bf16[12,4], index: 6, kind: input, shape index: {}]   ;;  %s4199_s7 = inlined_call_operand.hbm [shape: bf16[4,4], index: 7, kind: input, shape index: {}]   ;;  %s4200_s8 = inlined_call_operand.hbm [shape: f32[2,4,256], index: 8, kind: output, shape index: {}]  }
   0x1   :  { %4236 = sst [smem:[#allocation43_spill]] %s4192_s0 }
   0x2   :  { %4237 = sst [smem:[#allocation44_spill]] %s4194_s2 }
   0x3   :  { %4238 = sst [smem:[#allocation45_spill]] %s4195_s3 }
   0x4   :  { %4239 = sst [smem:[#allocation46_spill]] %s4196_s4 }
   0x5   :  { %13 = vsyncpa [#allocation3], 0 }
   0x6   :  { %15 = vsyncpa [#allocation3 + $0x1], 0 }
   0x7   :  { %16 = vsyncpa [#allocation6], 0 }
   0x8   :  { %18 = vsyncpa [#allocation6 + $0x1], 0 }
   0x9   :  { %19 = vsyncpa [#allocation9], 0 }
   0xa   :  { %20 = vsyncpa [#allocation12], 0 }
   0xb   :  { %21 = vsyncpa [#allocation15], 0 }
   0xc   :  { %22 = vsyncpa [#allocation4], 0 }
   0xd   :  { %24 = vsyncpa [#allocation4 + $0x1], 0  ;;  %s3068_s27 = smov 0   ;;  %s3070_s28 = smov 0  }
   0xe   :  { %s3072_s29 = smov 0   ;;  %s3074_s30 = smov 0  }
   0xf LB: > { %s2999_s9 = smov [#allocation7]   ;;  %s3089_s11 = sadd.s32 4294967295, %s2997_s30   ;;  %s2997_s30 = sphi %s3074_s30, %s4343_s30   ;;  %s2993_s29 = sphi %s3072_s29, %s4342_s29   ;;  %s2989_s28 = sphi %s3070_s28, %s4341_s28   ;;  %s2985_s27 = sphi %s3068_s27, %s4340_s27  }
  0x10   : > { %s252_s10 = sshll.u32 %s2999_s9, 4  ;;  %p2188_p0 = scmp.ge.s32.totalorder %s2997_s30, 1  ;;  %s3094_s10 = int_to_ptr.vmem [resolvable:$true] %s252_s10 }
  0x11   : > { %p4201_p1 = scmp.eq.s32.totalorder %s3089_s11, 0  ;;  %p239_p2 = scmp.lt.s32.totalorder %s2997_s30, 3 }
  0x12   : > { %s3000_s13 = smov [#allocation8]   ;;  %s3001_s15 = smov [#allocation11]  }
  0x13   : > { %p3096_p3 = pnand %p2188_p0, %p239_p2  ;;  %s263_s14 = sshll.u32 %s3000_s13, 4  ;;  %s3103_s14 = int_to_ptr.vmem [resolvable:$true] %s263_s14 }
  0x14   : > { %s285_s16 = sshll.u32 %s3001_s15, 4  ;;  %s3002_s18 = smov [#allocation10]   ;;  %s3111_s16 = int_to_ptr.vmem [resolvable:$true] %s285_s16 }
  0x15   : > { %s4240_s12 = scalar_select %p3096_p3, 1, 0 }
  0x16   : > { %p2276_p5 = pneg %p3096_p3  ;;  %s3113_s19 = sshll.u32 %s3002_s18, 4  ;;  %s275_s19 = int_to_ptr.vmem [resolvable:$true] %s3113_s19 }
  0x17   : > { %s4242_s2 = sld [smem:[#allocation44_spill]] }
  0x18   : > { %p3107_p6 = pnand %p2276_p5, %p4201_p1 }
  0x1a   : > { %p3123_p8 = pneg %p3107_p6 }
  0x1d   : > { %s2683_s22 = scalar_lea.hbm %s4242_s2, 32 }
  0x1e   : > { %p2684_p7 = scmp.ne.s32.totalorder %s4242_s2, %s2683_s22  ;;  %p2690_p11 = scmp.lt.u32.totalorder %s2683_s22, %s4242_s2 }
  0x20   : > { %p2686_p9 = pnand %p3123_p8, %p2684_p7 }
  0x22   : > { %p2687_p10 = pneg %p2686_p9 }
  0x24   : > { %p2692_p12 = pnand %p2690_p11, %p2687_p10 }
  0x26   : > { %2695 = shalt.err (!%p2692_p12)
}
  0x27   : > { %s2696_s13 = scalar_lea.vmem %s3094_s10, 32  ;;  %p2704_p5 = scmp.lt.s32.totalorder %s3094_s10, %s3094_s10 }
  0x28   : > { %p2697_p13 = scmp.ne.s32.totalorder %s3094_s10, %s2696_s13  ;;  %p2705_p4 = scmp.lt.s32.totalorder %s2696_s13, %s2696_s13 }
  0x2a   : > { %p2699_p0 = pnand %p2697_p13, %p3123_p8  ;;  %p2706_p7 = por %p2705_p4, %p2704_p5 }
  0x2c   : > { %p2700_p2 = pneg %p2699_p0 }
  0x2e   : > { %p2707_p9 = pnand %p2706_p7, %p2700_p2 }
  0x30   : > { %2710 = shalt.err (!%p2707_p9)
}
  0x31   : > { %2279 = dma.hbm_to_vmem [thread:$0]  (!%p3107_p6), %s4242_s2, 32, %s3094_s10, [#allocation6]  }
  0x32   : > { %s4244_s3 = sld [smem:[#allocation45_spill]] }
  0x38   : > { %s2711_s22 = scalar_lea.hbm %s4244_s3, 32 }
  0x39   : > { %p2712_p10 = scmp.ne.s32.totalorder %s4244_s3, %s2711_s22  ;;  %p2718_p12 = scmp.lt.u32.totalorder %s2711_s22, %s4244_s3 }
  0x3b   : > { %p2714_p4 = pnand %p2712_p10, %p3123_p8 }
  0x3d   : > { %p2715_p11 = pneg %p2714_p4 }
  0x3f   : > { %p2720_p13 = pnand %p2718_p12, %p2715_p11 }
  0x41   : > { %2723 = shalt.err (!%p2720_p13)
}
  0x42   : > { %s2724_s10 = scalar_lea.vmem %s3103_s14, 32  ;;  %p2732_p7 = scmp.lt.s32.totalorder %s3103_s14, %s3103_s14 }
  0x43   : > { %p2725_p0 = scmp.ne.s32.totalorder %s3103_s14, %s2724_s10  ;;  %p2733_p9 = scmp.lt.s32.totalorder %s2724_s10, %s2724_s10 }
  0x45   : > { %p2727_p2 = pnand %p2725_p0, %p3123_p8  ;;  %p2734_p10 = por %p2733_p9, %p2732_p7 }
  0x47   : > { %p2728_p5 = pneg %p2727_p2 }
  0x49   : > { %p2735_p4 = pnand %p2734_p10, %p2728_p5 }
  0x4b   : > { %2738 = shalt.err (!%p2735_p4)
}
  0x4c   : > { %2282 = dma.hbm_to_vmem [thread:$0]  (!%p3107_p6), %s4244_s3, 32, %s3103_s14, [#allocation9]  }
  0x4d   : > { %s2739_s21 = scalar_lea.hbm %s4197_s5, 64 }
  0x4e   : > { %p2740_p11 = scmp.ne.s32.totalorder %s4197_s5, %s2739_s21  ;;  %p2746_p0 = scmp.lt.u32.totalorder %s2739_s21, %s4197_s5 }
  0x50   : > { %p2742_p12 = pnand %p2740_p11, %p3123_p8 }
  0x52   : > { %p2743_p13 = pneg %p2742_p12 }
  0x54   : > { %p2748_p2 = pnand %p2746_p0, %p2743_p13 }
  0x56   : > { %2751 = shalt.err (!%p2748_p2)
}
  0x57   : > { %s2752_s14 = scalar_lea.vmem %s3111_s16, 64  ;;  %p2760_p10 = scmp.lt.s32.totalorder %s3111_s16, %s3111_s16 }
  0x58   : > { %p2753_p5 = scmp.ne.s32.totalorder %s3111_s16, %s2752_s14  ;;  %p2761_p4 = scmp.lt.s32.totalorder %s2752_s14, %s2752_s14 }
  0x5a   : > { %p2755_p7 = pnand %p2753_p5, %p3123_p8  ;;  %p2762_p11 = por %p2761_p4, %p2760_p10 }
  0x5c   : > { %p2756_p9 = pneg %p2755_p7 }
  0x5e   : > { %p2763_p12 = pnand %p2762_p11, %p2756_p9 }
  0x60   : > { %2766 = shalt.err (!%p2763_p12)
}
  0x61   : > { %2288 = dma.hbm_to_vmem [thread:$0]  (!%p3107_p6), %s4197_s5, 64, %s3111_s16, [#allocation12]  }
  0x62   : > { %s3003_s13 = smov [#allocation13]   ;;  %s4245_s4 = sld [smem:[#allocation46_spill]] }
  0x63   : > { %s295_s15 = sshll.u32 %s3003_s13, 4  ;;  %s296_s15 = int_to_ptr.vmem [resolvable:$true] %s295_s15 }
  0x68   : > { %s2767_s21 = scalar_lea.hbm %s4245_s4, 32 }
  0x69   : > { %p2768_p13 = scmp.ne.s32.totalorder %s4245_s4, %s2767_s21  ;;  %p2774_p5 = scmp.lt.u32.totalorder %s2767_s21, %s4245_s4 }
  0x6b   : > { %p2770_p0 = pnand %p2768_p13, %p3123_p8 }
  0x6d   : > { %p2771_p2 = pneg %p2770_p0 }
  0x6f   : > { %p2776_p7 = pnand %p2774_p5, %p2771_p2 }
  0x71   : > { %2779 = shalt.err (!%p2776_p7)
}
  0x72   : > { %s2780_s16 = scalar_lea.vmem %s275_s19, 32  ;;  %p2788_p11 = scmp.lt.s32.totalorder %s275_s19, %s275_s19 }
  0x73   : > { %p2781_p9 = scmp.ne.s32.totalorder %s275_s19, %s2780_s16  ;;  %p2789_p12 = scmp.lt.s32.totalorder %s2780_s16, %s2780_s16 }
  0x75   : > { %p2783_p10 = pnand %p2781_p9, %p3123_p8  ;;  %p2790_p1 = por %p2789_p12, %p2788_p11 }
  0x77   : > { %p2784_p4 = pneg %p2783_p10 }
  0x79   : > { %p2791_p3 = pnand %p2790_p1, %p2784_p4 }
  0x7b   : > { %2794 = shalt.err (!%p2791_p3)
}
  0x7c   : > { %2285 = dma.hbm_to_vmem [thread:$0]  (!%p3107_p6), %s4245_s4, 32, %s275_s19, [#allocation9]  }
  0x7d   : > { %s2795_s18 = scalar_lea.hbm %s4198_s6, 128 }
  0x7e   : > { %p2796_p13 = scmp.ne.s32.totalorder %s4198_s6, %s2795_s18  ;;  %p2802_p3 = scmp.lt.u32.totalorder %s2795_s18, %s4198_s6 }
  0x80   : > { %p2798_p0 = pnand %p2796_p13, %p3123_p8 }
  0x82   : > { %p2799_p1 = pneg %p2798_p0 }
  0x84   : > { %p2804_p2 = pnand %p2802_p3, %p2799_p1 }
  0x86   : > { %2807 = shalt.err (!%p2804_p2)
}
  0x87   : > { %s2808_s24 = scalar_lea.vmem %s296_s15, 128  ;;  %p2816_p10 = scmp.lt.s32.totalorder %s296_s15, %s296_s15 }
  0x88   : > { %p2809_p5 = scmp.ne.s32.totalorder %s296_s15, %s2808_s24  ;;  %p2817_p4 = scmp.lt.s32.totalorder %s2808_s24, %s2808_s24 }
  0x8a   : > { %p2811_p7 = pnand %p2809_p5, %p3123_p8  ;;  %p2818_p11 = por %p2817_p4, %p2816_p10 }
  0x8c   : > { %p2812_p9 = pneg %p2811_p7 }
  0x8e   : > { %p2819_p12 = pnand %p2818_p11, %p2812_p9 }
  0x90   : > { %2822 = shalt.err (!%p2819_p12)
}
  0x91   : > { %s3004_s19 = smov 64   ;;  %s3005_s26 = smov 4  }
  0x92   : > { %2291 = dma.hbm_to_vmem [thread:$0]  (!%p3107_p6), %s4198_s6, 128, %s296_s15, [#allocation12], %s3004_s19, %s3004_s19, %s3005_s26  }
  0x93   : > { %s3006_s9 = smov [#allocation14]   ;;  %s2823_s20 = scalar_lea.hbm %s4199_s7, 32 }
  0x94   : > { %s309_s10 = sshll.u32 %s3006_s9, 4  ;;  %p2824_p13 = scmp.ne.s32.totalorder %s4199_s7, %s2823_s20  ;;  %s310_s10 = int_to_ptr.vmem [resolvable:$true] %s309_s10 }
  0x95   : > { %p2830_p3 = scmp.lt.u32.totalorder %s2823_s20, %s4199_s7 }
  0x96   : > { %p2826_p0 = pnand %p2824_p13, %p3123_p8 }
  0x98   : > { %p2827_p1 = pneg %p2826_p0 }
  0x9a   : > { %p2832_p2 = pnand %p2830_p3, %p2827_p1 }
  0x9c   : > { %2835 = shalt.err (!%p2832_p2)
}
  0x9d   : > { %s2836_s15 = scalar_lea.vmem %s310_s10, 32  ;;  %p2844_p10 = scmp.lt.s32.totalorder %s310_s10, %s310_s10 }
  0x9e   : > { %p2837_p5 = scmp.ne.s32.totalorder %s310_s10, %s2836_s15  ;;  %p2845_p4 = scmp.lt.s32.totalorder %s2836_s15, %s2836_s15 }
  0xa0   : > { %p2839_p7 = pnand %p2837_p5, %p3123_p8  ;;  %p2846_p11 = por %p2845_p4, %p2844_p10 }
  0xa2   : > { %p2840_p9 = pneg %p2839_p7 }
  0xa4   : > { %p2847_p12 = pnand %p2846_p11, %p2840_p9 }
  0xa6   : > { %2850 = shalt.err (!%p2847_p12)
}
  0xa7   : > { %2294 = dma.hbm_to_vmem [thread:$0]  (!%p3107_p6), %s4199_s7, 32, %s310_s10, [#allocation15]  }
  0xa8   : > { %s2187_s25 = sadd.s32 4294967294, %s2997_s30   ;;  %s3247_s17 = sadd.s32 1, %s2997_s30  }
  0xa9   : > { %s34_s16 = ssub.s32 %s2997_s30, %s3247_s17  ;;  %s37_s14 = sadd.s32 1, %s2993_s29 }
  0xaa   : > { %p35_p8 = scmp.eq.s32.totalorder %s34_s16, 0  ;;  %p44_p13 = scmp.ne.s32.totalorder %s2993_s29, %s2989_s28 }
  0xab   : > { %p45_p0 = scmp.eq.s32.totalorder %s2997_s30, 0  ;;  %p50_p1 = scmp.ne.s32.totalorder %s2989_s28, %s2985_s27 }
  0xac   : > { %s3258_s9 = scalar_select %p35_p8, %s2993_s29, %s37_s14  }
  0xad   : > { %p3260_p3 = por %p45_p0, %p44_p13  ;;  %p4247_p2 = scmp.eq.s32.totalorder %s3089_s11, 0 }
  0xae   : > { %p226_p5 = scmp.eq.s32.totalorder %s3089_s11, 1  ;;  %p232_p7 = scmp.eq.s32.totalorder %s2187_s25, 1 }
  0xaf   : > { %p3266_p6 = por %p4247_p2, %p50_p1  ;;  %p2312_p9 = scmp.lt.s32.totalorder %s2997_s30, 2 }
  0xb0   : > { %s3273_s18 = sand.u32 1, %s2993_s29   ;;  %p3275_p10 = por %p226_p5, %p44_p13 }
  0xb1   : > { %s4248_s10 = scalar_select %p3266_p6, 1, 0 }
  0xb2   : > { %s4249_s20 = scalar_select %p3275_p10, 1, 0 }
  0xb3   : > { %p3279_p4 = por %p232_p7, %p50_p1  ;;  %s2196_s22 = sshll.u32 %s3273_s18, 4 }
  0xb4   : > { %s2244_s23 = sshll.u32 %s2997_s30, 8  ;;  %s4251_s0 = sld [smem:[#allocation43_spill]] }
  0xb5   : > { %s4250_s21 = scalar_select %p3279_p4, 1, 0 }
  0xb6   : > { %s324_s26 = scalar_lea.vmem [#allocation2], %s2196_s22  ;;  %p3294_p11 = pnand %p2312_p9, %p3260_p3 }
  0xb7   : > { %s332_s25 = sshll.u32 %s324_s26, 4  ;;  %s2199_s2 = sshll.u32 %s3273_s18, 2  ;;  %s3290_s25 = int_to_ptr.vmem [resolvable:$true] %s332_s25 }
  0xb8   : > { %s321_s24 = scalar_lea.sflag [#allocation3], %s3273_s18  ;;  %p2853_p8 = pneg %p3294_p11 }
  0xba   : > { %s3288_s19 = scalar_lea.hbm %s4251_s0, %s2244_s23  ;;  %s2856_s13 = scalar_lea.hbm %s4251_s0, 512 }
  0xbb   : > { %s2851_s23 = scalar_lea.hbm %s3288_s19, 256  ;;  %p2857_p1 = scmp.lt.u32.totalorder %s3288_s19, %s4251_s0 }
  0xbc   : > { %p2852_p12 = scmp.ne.s32.totalorder %s3288_s19, %s2851_s23  ;;  %p2858_p3 = scmp.lt.u32.totalorder %s2856_s13, %s2851_s23 }
  0xbd   : > { %p2860_p5 = scmp.lt.u32.totalorder %s2851_s23, %s3288_s19 }
  0xbe   : > { %p2854_p13 = pnand %p2853_p8, %p2852_p12  ;;  %p2859_p2 = por %p2858_p3, %p2857_p1 }
  0xc0   : > { %p2855_p0 = pneg %p2854_p13  ;;  %p2861_p7 = por %p2860_p5, %p2859_p2 }
  0xc2   : > { %p2862_p9 = pnand %p2861_p7, %p2855_p0 }
  0xc4   : > { %2865 = shalt.err (!%p2862_p9)
}
  0xc5   : > { %s2866_s14 = scalar_lea.vmem %s3290_s25, 256  ;;  %s3007_s22 = smov [#allocation2]  }
  0xc6   : > { %p2867_p12 = scmp.ne.s32.totalorder %s3290_s25, %s2866_s14  ;;  %s2871_s15 = sshll.u32 %s3007_s22, 4  ;;  %s2872_s15 = int_to_ptr.vmem [resolvable:$false] %s2871_s15 }
  0xc7   : > { %s2873_s3 = scalar_lea.vmem %s2872_s15, 512  ;;  %p2874_p10 = scmp.lt.s32.totalorder %s3290_s25, %s2872_s15 }
  0xc8   : > { %p2869_p13 = pnand %p2867_p12, %p2853_p8  ;;  %p2875_p1 = scmp.lt.s32.totalorder %s2873_s3, %s2866_s14 }
  0xca   : > { %p2870_p4 = pneg %p2869_p13  ;;  %p2876_p3 = por %p2875_p1, %p2874_p10 }
  0xcc   : > { %p2877_p2 = pnand %p2876_p3, %p2870_p4 }
  0xce   : > { %2880 = shalt.err (!%p2877_p2)
}
  0xcf   : > { %2298 = dma.hbm_to_vmem [thread:$0]  (!%p3294_p11), %s3288_s19, 256, %s3290_s25, %s321_s24  }
  0xd0   : > { %s2200_s23 = sshll.u32 %s2997_s30, 6  ;;  %s343_s14 = scalar_lea.vmem [#allocation5], %s2199_s2 }
  0xd1   : > { %s3330_s22 = scalar_lea.hbm %s4193_s1, %s2200_s23  ;;  %s350_s15 = sshll.u32 %s343_s14, 4  ;;  %s351_s15 = int_to_ptr.vmem [resolvable:$true] %s350_s15 }
  0xd2   : > { %s4253_s3 = sand.u32 1, %s2997_s30   ;;  %s2881_s4 = scalar_lea.hbm %s3330_s22, 64 }
  0xd3   : > { %s340_s0 = scalar_lea.sflag [#allocation6], %s4253_s3  ;;  %p2882_p10 = scmp.ne.s32.totalorder %s3330_s22, %s2881_s4 }
  0xd4   : > { %s2886_s24 = scalar_lea.hbm %s4193_s1, 128  ;;  %p2887_p5 = scmp.lt.u32.totalorder %s3330_s22, %s4193_s1 }
  0xd5   : > { %p2884_p4 = pnand %p2882_p10, %p2853_p8  ;;  %p2888_p7 = scmp.lt.u32.totalorder %s2886_s24, %s2881_s4 }
  0xd6   : > { %p2890_p12 = scmp.lt.u32.totalorder %s2881_s4, %s3330_s22 }
  0xd7   : > { %p2885_p0 = pneg %p2884_p4  ;;  %p2889_p9 = por %p2888_p7, %p2887_p5 }
  0xd9   : > { %p2891_p13 = por %p2890_p12, %p2889_p9 }
  0xdb   : > { %p2892_p1 = pnand %p2891_p13, %p2885_p0 }
  0xdd   : > { %2895 = shalt.err (!%p2892_p1)
}
  0xde   : > { %s2896_s2 = scalar_lea.vmem %s351_s15, 64  ;;  %s3008_s13 = smov [#allocation5]  }
  0xdf   : > { %p2897_p3 = scmp.ne.s32.totalorder %s351_s15, %s2896_s2  ;;  %s2901_s26 = sshll.u32 %s3008_s13, 4  ;;  %s2902_s26 = int_to_ptr.vmem [resolvable:$false] %s2901_s26 }
  0xe0   : > { %s2903_s14 = scalar_lea.vmem %s2902_s26, 128  ;;  %p2904_p4 = scmp.lt.s32.totalorder %s351_s15, %s2902_s26 }
  0xe1   : > { %p2899_p2 = pnand %p2897_p3, %p2853_p8  ;;  %p2905_p6 = scmp.lt.s32.totalorder %s2903_s14, %s2896_s2 }
  0xe3   : > { %p2900_p10 = pneg %p2899_p2  ;;  %p2906_p5 = por %p2905_p6, %p2904_p4 }
  0xe5   : > { %p2907_p7 = pnand %p2906_p5, %p2900_p10 }
  0xe7   : > { %2910 = shalt.err (!%p2907_p7)
}
  0xe8   : > { %2301 = dma.hbm_to_vmem [thread:$0]  (!%p3294_p11), %s3330_s22, 64, %s351_s15, %s340_s0  }
  0xe9   : > { %p4254_p0 = scmp.ne.s32.totalorder %s4240_s12, 0 }
  0xeb   : > { %359 = sbr.rel (%p4254_p0) target bundleno = 2708 (0xa94), region = 52 }
  0xf2   : > { %s3358_s4 = sand.u32 1, %s2989_s28   ;;  %p4255_p8 = scmp.ne.s32.totalorder %s4248_s10, 0 }
  0xf3   : > { %s2202_s3 = sshll.u32 %s3358_s4, 4  ;;  %s362_s19 = scalar_lea.sflag [#allocation3], %s3358_s4 }
  0xf4   : > { %s365_s25 = scalar_lea.vmem [#allocation2], %s2202_s3 }
  0xf5   : > { %2956 = dma.done.wait (%p4255_p8), %s362_s19, 256  }
  0xf6   : > { %2958 = vsyncadd (%p4255_p8), %s362_s19, 4294967040  ;;  %s370_s0 = sand.u32 1, %s3089_s11   ;;  %s2203_s12 = sshll.u32 %s3358_s4, 2 }
  0xf7   : > { %s371_s16 = scalar_lea.sflag [#allocation6], %s370_s0  ;;  %s3368_s22 = scalar_lea.vmem [#allocation5], %s2203_s12 }
  0xf8   : > { %2960 = dma.done.wait (%p4255_p8), %s371_s16, 64  }
  0xf9   : > { %2962 = vsyncadd (%p4255_p8), %s371_s16, 4294967232  ;;  %p4256_p6 = scmp.eq.s32.totalorder %s3089_s11, 0 }
  0xfb   : > { %2964 = dma.done.wait (%p4256_p6), [#allocation6], 32   ;;  %p4257_p11 = pmov %p4256_p6 }
  0xfc   : > { %p4258_p9 = pmov %p4256_p6 }
  0xfd   : > { %2966 = vsyncadd (%p4257_p11), [#allocation6], 4294967264 }
  0xfe   : > { %2968 = dma.done.wait (%p4258_p9), [#allocation9], 64   ;;  %p4259_p12 = pmov %p4256_p6 }
  0xff   : > { %p4260_p13 = pmov %p4256_p6 }
 0x100   : > { %2970 = vsyncadd (%p4259_p12), [#allocation9], 4294967232 }
 0x101   : > { %2972 = dma.done.wait (%p4260_p13), [#allocation12], 192   ;;  %p4261_p1 = pmov %p4256_p6 }
 0x103   : > { %2974 = vsyncadd (%p4261_p1), [#allocation12], 4294967104  ;;  %p4262_p3 = pmov %p4261_p1 }
 0x104   : > { %p4263_p2 = pmov %p4261_p1 }
 0x105   : > { %2976 = dma.done.wait (%p4262_p3), [#allocation15], 32  }
 0x106   : > { %2978 = vsyncadd (%p4263_p2), [#allocation15], 4294967264  ;;  %v3390_v0 = vld [vmem:[%s365_s25] sm:$0xff]  ;;  %v3392_v1 = vld [vmem:[%s365_s25 + $0x8] sm:$0xff]  ;;  %s3009_s10 = smov 15   ;;  %s3010_s15 = smov 113   ;;  %v437_v14 = vlaneseq }
 0x107   : > { %v479_v2 = vmul.f32 0.70710677, %v3390_v0  ;;  %v480_v3 = vmul.f32 0.70710677, %v3392_v1  ;;  %v477_v4 = vmul.f32 0.5, %v3390_v0  ;;  %v478_v6 = vmul.f32 0.5, %v3392_v1 }
 0x108   : > { %s3011_s24 = smov 127   ;;  %s3012_s18 = smov 1   ;;  %v438_v15 = vand.u32 127, %v437_v14  ;;  %vm520_vm0 = vcmask 121856   ;;  %vm493_vm1 = vcmask 924672   ;;  %vm529_vm2 = vcmask 1039360  }
 0x109   : > { %2482 = verf.f32 %v479_v2  ;;  %s3013_s23 = smov 16   ;;  %vm504_vm3 = vcmask 7168   ;;  %vm635_vm8 = vcmask 1043456   ;;  %s3014_s2 = smov 112   ;;  %v4205_v59 = vmov 0  }
 0x10a   : > { %2484 = verf.f32 %v480_v3  ;;  %v439_v16 = vadd.s32 128, %v438_v15  ;;  %v444_v17 = vand.u32 15, %v438_v15  ;;  %715 = vmatprep.mubr.bf16.mxu0 %v4205_v59  ;;  %2423 = vset.pattern.permute.xlu0 %v4205_v59  ;;  %v3466_v60 = vld [vmem:[#allocation11] sm:$0xf]  ;;  %v724_v61 = vld [vmem:[%s3368_s22] sm:$0xf] }
 0x10b   : > { %2424 = vset.pattern.permute.xlu1 %v4205_v59  ;;  %1245 = vmatprep.mubr.bf16.mxu1 %v4205_v59  ;;  %vm548_vm9 = vcmask 130048   ;;  %vm589_vm10 = vcmask 916480   ;;  %vm673_vm11 = vcmask 588800   ;;  %vm884_vm12 = vcmask 1041408   ;;  %s2210_s13 = sshll.u32 %s3358_s4, 3  ;;  %s2245_s26 = sshll.u32 %s3089_s11, 7 }
 0x10c   : > { %v451_v18 = vand.u32 15, %v439_v16  ;;  %vm3411_vm4 = vcmp.eq.s32.totalorder %v444_v17, 15  ;;  %vm3421_vm6 = vcmp.eq.s32.totalorder %v444_v17, 0  ;;  %v3016_v32 = vmov 1   ;;  %s435_s14 = scalar_lea.vmem [#allocation16], %s2210_s13  ;;  %s4148_s0 = scalar_lea.hbm %s4200_s8, %s2245_s26 }
 0x10d   : > { %vm895_vm13 = vcmask 1045504   ;;  %vm922_vm14 = vcmask 293888   ;;  %vm975_vm15 = vcmask 64512   ;;  %s2037_s3 = sshll.u32 %s435_s14, 4  ;;  %s2023_s12 = scalar_lea.sflag [#allocation4], %s3358_s4  ;;  %s4150_s3 = int_to_ptr.vmem [resolvable:$true] %s2037_s3 }
 0x10e   : > { %vm3415_vm5 = vcmp.eq.s32.totalorder %v451_v18, 15  ;;  %vm3425_vm7 = vcmp.eq.s32.totalorder %v451_v18, 0  ;;  %s2911_s16 = scalar_lea.vmem %s4150_s3, 128  ;;  %p4337_p4 = scmp.ne.s32.totalorder %s4249_s20, 0 }
 0x10f   : > { %p2912_p10 = scmp.ne.s32.totalorder %s4150_s3, %s2911_s16  ;;  %s3022_s11 = smov [#allocation16]  }
 0x110   : > { %s2915_s22 = sshll.u32 %s3022_s11, 4  ;;  %s2916_s22 = int_to_ptr.vmem [resolvable:$false] %s2915_s22 }
 0x111   : > { %p2913_p5 = pnand %p2912_p10, %p4337_p4  ;;  %p2918_p0 = scmp.lt.s32.totalorder %s4150_s3, %s2916_s22 }
 0x113   : > { %v2483_v5 = vpop.eup %2482  ;;  %p2914_p7 = pneg %p2913_p5 }
 0x114   : > { %v2485_v7 = vpop.eup %2484  ;;  %v483_v8 = vadd.f32 1.0, %v2483_v5 }
 0x115   : > { %v484_v9 = vadd.f32 1.0, %v2485_v7 }
 0x116   : > { %v3398_v10 = vmul.f32 %v483_v8, %v477_v4 }
 0x117   : > { %v3400_v11 = vmul.f32 %v484_v9, %v478_v6 }
 0x118   : > { %v581_v51 = vpack.c.bf16 %v3398_v10, %v3398_v10 }
 0x119   : > { %v2383_v12 = vpack.i.bf16 %v3398_v10, %v3400_v11  ;;  %v2373_v13 = vpack.i.bf16 %v3400_v11, %v3398_v10  ;;  %v582_v49 = vpack.c.bf16 %v3400_v11, %v3400_v11 }
 0x11b   : > { %2384 = vrot.lane.b32.xlu1 %v2383_v12, %s3009_s10  ;;  %2374 = vrot.lane.b32.xlu0 %v2373_v13, %s3010_s15 }
 0x11f   : > { %2389 = vrot.lane.b32.xlu1 %v2373_v13, %s3011_s24  ;;  %2379 = vrot.lane.b32.xlu0 %v2383_v12, %s3012_s18 }
 0x123   : > { %2394 = vrot.lane.b32.xlu0 %v2383_v12, %s3013_s23 }
 0x18d   : > { %v2385_v19 = vpop.permute.xlu1 %2384  ;;  %v2375_v20 = vpop.permute.xlu0 %2374 }
 0x18e   : > { %v2387_v21 = vunpack.i.h.bf16 %v2385_v19  ;;  %v2386_v22 = vunpack.i.l.bf16 %v2385_v19  ;;  %v2377_v23 = vunpack.i.h.bf16 %v2375_v20  ;;  %v2376_v24 = vunpack.i.l.bf16 %v2375_v20 }
 0x190   : > { %v521_v27 = vsel %vm520_vm0, %v2387_v21, %v2386_v22  ;;  %v524_v28 = vsel %vm520_vm0, %v2386_v22, %v2387_v21  ;;  %v494_v37 = vsel %vm493_vm1, %v2376_v24, %v2377_v23  ;;  %v498_v38 = vsel %vm493_vm1, %v2377_v23, %v2376_v24 }
 0x191   : > { %v2390_v29 = vpop.permute.xlu1 %2389  ;;  %v2380_v30 = vpop.permute.xlu0 %2379 }
 0x192   : > { %v2392_v33 = vunpack.i.h.bf16 %v2390_v29  ;;  %v2391_v34 = vunpack.i.l.bf16 %v2390_v29  ;;  %v2382_v35 = vunpack.i.h.bf16 %v2380_v30  ;;  %v2381_v36 = vunpack.i.l.bf16 %v2380_v30 }
 0x194   : > { %v530_v39 = vsel %vm529_vm2, %v2391_v34, %v2392_v33  ;;  %v534_v40 = vsel %vm529_vm2, %v2392_v33, %v2391_v34  ;;  %v505_v41 = vsel %vm504_vm3, %v2382_v35, %v2381_v36  ;;  %v508_v42 = vsel %vm504_vm3, %v2381_v36, %v2382_v35 }
 0x195   : > { %v539_v43 = vsel %vm3411_vm4, %v524_v28, %v530_v39  ;;  %v540_v44 = vsel %vm3415_vm5, %v521_v27, %v534_v40  ;;  %v3441_v45 = vsel %vm3421_vm6, %v494_v37, %v508_v42  ;;  %v514_v46 = vsel %vm3425_vm7, %v498_v38, %v505_v41  ;;  %v2395_v62 = vpop.permute.xlu0 %2394 }
 0x196   : > { %v2403_v47 = vpack.i.bf16 %v539_v43, %v540_v44  ;;  %v2398_v48 = vpack.i.bf16 %v3441_v45, %v514_v46  ;;  %v584_v50 = vpack.c.bf16 %v540_v44, %v540_v44  ;;  %v583_v52 = vpack.c.bf16 %v539_v43, %v539_v43 }
 0x197   : > { %v2413_v53 = vpack.i.bf16 %v514_v46, %v3441_v45  ;;  %v2418_v58 = vpack.i.bf16 %v540_v44, %v539_v43  ;;  %v2397_v63 = vunpack.i.h.bf16 %v2395_v62  ;;  %v2396_v2 = vunpack.i.l.bf16 %v2395_v62 }
 0x198   : > { %2404 = vrot.lane.b32.xlu0 %v2403_v47, %s3013_s23  ;;  %2399 = vrot.lane.b32.xlu1 %v2398_v48, %s3013_s23  ;;  %v630_v54 = vrot.slane %v584_v50, 4  ;;  %v629_v55 = vrot.slane %v583_v52, 4  ;;  %v580_v15 = vpack.c.bf16 %v514_v46, %v514_v46  ;;  %v579_v29 = vpack.c.bf16 %v3441_v45, %v3441_v45 }
 0x199   : > { %v560_v3 = vsel %vm548_vm9, %v2397_v63, %v2396_v2  ;;  %v563_v4 = vsel %vm548_vm9, %v2396_v2, %v2397_v63  ;;  %v468_v2 = vld [vmem:[#allocation7] sm:$0x3] }
 0x19a   : > { %v3456_v56 = vsel %vm635_vm8, %v582_v49, %v630_v54  ;;  %v3459_v57 = vsel %vm635_vm8, %v581_v51, %v629_v55  ;;  %v565_v5 = vpack.c.bf16 %v560_v3, %v560_v3  ;;  %v564_v6 = vpack.c.bf16 %v563_v4, %v563_v4 }
 0x19b   : > { %v626_v34 = vrot.slane %v580_v15, 4  ;;  %v625_v43 = vrot.slane %v579_v29, 4 }
 0x19c   : > { %2414 = vrot.lane.b32.xlu0 %v2413_v53, %s3014_s2  ;;  %2409 = vrot.lane.b32.xlu1 %v2373_v13, %s3014_s2  ;;  %v622_v13 = vrot.slane %v565_v5, 4  ;;  %v621_v14 = vrot.slane %v564_v6, 4 }
 0x1a0   : > { %2419 = vrot.lane.b32.xlu1 %v2418_v58, %s3014_s2  ;;  %670 = vperm.xlu0 %2423, %v3466_v60  }
 0x1a4   : > { %727 = vperm.xlu1 %2424, %v724_v61  }
 0x1a8   : > { %2475 = vset.pattern.permute.xlu1 %v3016_v32 }
 0x20a   : > { %v2405_v7 = vpop.permute.xlu0 %2404  ;;  %v2400_v8 = vpop.permute.xlu1 %2399 }
 0x20b   : > { %v2407_v9 = vunpack.i.h.bf16 %v2405_v7  ;;  %v2406_v10 = vunpack.i.l.bf16 %v2405_v7  ;;  %v2402_v11 = vunpack.i.h.bf16 %v2400_v8  ;;  %v2401_v12 = vunpack.i.l.bf16 %v2400_v8 }
 0x20d   : > { %v549_v16 = vsel %vm548_vm9, %v2402_v11, %v2401_v12  ;;  %v552_v17 = vsel %vm548_vm9, %v2401_v12, %v2402_v11  ;;  %v573_v18 = vsel %vm548_vm9, %v2407_v9, %v2406_v10  ;;  %v576_v24 = vsel %vm548_vm9, %v2406_v10, %v2407_v9 }
 0x20e   : > { %v2415_v19 = vpop.permute.xlu0 %2414  ;;  %v2410_v20 = vpop.permute.xlu1 %2409  ;;  %v554_v21 = vpack.c.bf16 %v549_v16, %v549_v16  ;;  %v553_v22 = vpack.c.bf16 %v552_v17, %v552_v17  ;;  %v578_v23 = vpack.c.bf16 %v573_v18, %v573_v18  ;;  %v577_v37 = vpack.c.bf16 %v576_v24, %v576_v24 }
 0x20f   : > { %v2412_v27 = vunpack.i.h.bf16 %v2410_v20  ;;  %v2411_v28 = vunpack.i.l.bf16 %v2410_v20  ;;  %v2417_v35 = vunpack.i.h.bf16 %v2415_v19  ;;  %v2416_v36 = vunpack.i.l.bf16 %v2415_v19 }
 0x210   : > { %v642_v30 = vsel %vm635_vm8, %v554_v21, %v622_v13  ;;  %v638_v33 = vsel %vm635_vm8, %v553_v22, %v621_v14  ;;  %v650_v39 = vsel %vm635_vm8, %v578_v23, %v626_v34  ;;  %v646_v44 = vsel %vm635_vm8, %v577_v37, %v625_v43 }
 0x211   : > { %683 = vmatprep.subr.bf16.mxu0 %v642_v30  ;;  %v605_v38 = vsel %vm589_vm10, %v2412_v27, %v2411_v28  ;;  %v601_v41 = vsel %vm589_vm10, %v2411_v28, %v2412_v27  ;;  %v594_v45 = vsel %vm589_vm10, %v2417_v35, %v2416_v36  ;;  %v590_v51 = vsel %vm589_vm10, %v2416_v36, %v2417_v35 }
 0x212   : > { %684 = vmatpush1.bf16.msra.mxu0 %v638_v33  ;;  %v607_v40 = vpack.c.bf16 %v605_v38, %v605_v38  ;;  %v2420_v42 = vpop.permute.xlu1 %2419  ;;  %v606_v46 = vpack.c.bf16 %v601_v41, %v601_v41  ;;  %v596_v50 = vpack.c.bf16 %v594_v45, %v594_v45  ;;  %v595_v58 = vpack.c.bf16 %v590_v51, %v590_v51 }
 0x213   : > { %685 = vmatprep.subr.bf16.mxu0 %v650_v39  ;;  %v2422_v47 = vunpack.i.h.bf16 %v2420_v42  ;;  %v2421_v48 = vunpack.i.l.bf16 %v2420_v42 }
 0x214   : > { %v634_v49 = vrot.slane %v607_v40, 4  ;;  %v633_v52 = vrot.slane %v606_v46, 4 }
 0x215   : > { %v616_v54 = vsel %vm589_vm10, %v2422_v47, %v2421_v48  ;;  %v612_v55 = vsel %vm589_vm10, %v2421_v48, %v2422_v47 }
 0x216   : > { %686 = vmatpush1.bf16.msra.mxu0 %v646_v44  ;;  %v666_v53 = vsel %vm635_vm8, %v596_v50, %v634_v49  ;;  %v662_v61 = vsel %vm635_vm8, %v595_v58, %v633_v52  ;;  %v618_v62 = vpack.c.bf16 %v616_v54, %v616_v54  ;;  %v617_v63 = vpack.c.bf16 %v612_v55, %v612_v55 }
 0x217   : > { %687 = vmatprep.subr.bf16.mxu0 %v3456_v56 }
 0x218   : > { %v678_v56 = vsel %vm635_vm8, %v617_v63, 0 }
 0x21a   : > { %688 = vmatpush1.bf16.msra.mxu0 %v3459_v57 }
 0x21b   : > { %689 = vmatprep.subr.bf16.mxu0 %v666_v53 }
 0x21e   : > { %690 = vmatpush1.bf16.msra.mxu0 %v662_v61 }
 0x21f   : > { %2211 = vmatprep.subr.msk.bf16.mxu0 %vm635_vm8, %v618_v62  ;;  %v671_v57 = vpop.permute.xlu0 %670 }
 0x222   : > { %692 = vmatpush1.bf16.msra.mxu0 %v678_v56 }
 0x223   : > { %v728_v4 = vpop.permute.xlu1 %727 }
 0x225   : > { %2212 = vmatmul.mubr.msk.bf16.vlgmr.msra.gmra.mrb[0].mxu0 %vm673_vm11, %v468_v2  ;;  %v3017_v2 = vmov 2  }
 0x226   : > { %964 = vmatprep.mubr.bf16.mxu0 %v4205_v59  ;;  %2476 = vset.pattern.permute.xlu0 %v3017_v2 }
 0x2f8   : > { %v717_v3 = vpop.f32.mrb[0].mxu0 }
 0x2f9   : > { %v718_v5 = vadd.f32 %v717_v3, %v671_v57  ;;  %v719_v6 = vpop.f32.mrb[1].mxu0 }
 0x2fa   : > { %v720_v7 = vadd.f32 %v719_v6, %v671_v57  ;;  %v721_v8 = vpop.f32.mrb[2].mxu0 }
 0x2fb   : > { %v730_v9 = vadd.f32 %v728_v4, %v718_v5  ;;  %v722_v10 = vpop.f32.mrb[3].mxu0 }
 0x2fc   : > { %v731_v11 = vadd.f32 %v728_v4, %v720_v7 }
 0x2fd   : > { %v734_v12 = vmul.f32 0.70710677, %v730_v9  ;;  %v732_v16 = vmul.f32 0.5, %v730_v9 }
 0x2fe   : > { %v735_v13 = vmul.f32 0.70710677, %v731_v11  ;;  %v733_v18 = vmul.f32 0.5, %v731_v11 }
 0x2ff   : > { %2486 = verf.f32 %v734_v12 }
 0x300   : > { %2488 = verf.f32 %v735_v13 }
 0x309   : > { %v2487_v14 = vpop.eup %2486 }
 0x30a   : > { %v2489_v15 = vpop.eup %2488  ;;  %v738_v17 = vadd.f32 1.0, %v2487_v14 }
 0x30b   : > { %v739_v19 = vadd.f32 1.0, %v2489_v15 }
 0x30c   : > { %v740_v20 = vmul.f32 %v738_v17, %v732_v16 }
 0x30d   : > { %v741_v21 = vmul.f32 %v739_v19, %v733_v18 }
 0x30e   : > { %v823_v62 = vpack.c.bf16 %v740_v20, %v740_v20 }
 0x30f   : > { %v2430_v22 = vpack.i.bf16 %v741_v21, %v740_v20  ;;  %v2425_v23 = vpack.i.bf16 %v740_v20, %v741_v21  ;;  %v824_v49 = vpack.c.bf16 %v741_v21, %v741_v21 }
 0x311   : > { %2431 = vrot.lane.b32.xlu0 %v2430_v22, %s3011_s24  ;;  %2426 = vrot.lane.b32.xlu1 %v2425_v23, %s3009_s10  ;;  %s2917_s10 = scalar_lea.vmem %s2916_s22, 256 }
 0x312   : > { %p2919_p8 = scmp.lt.s32.totalorder %s2917_s10, %s2911_s16 }
 0x314   : > { %p2920_p6 = por %p2919_p8, %p2918_p0 }
 0x315   : > { %2441 = vrot.lane.b32.xlu0 %v2425_v23, %s3012_s18  ;;  %2436 = vrot.lane.b32.xlu1 %v2430_v22, %s3010_s15 }
 0x316   : > { %p2921_p11 = pnand %p2920_p6, %p2914_p7 }
 0x319   : > { %2446 = vrot.lane.b32.xlu1 %v2425_v23, %s3013_s23 }
 0x383   : > { %v2432_v24 = vpop.permute.xlu0 %2431  ;;  %v2427_v27 = vpop.permute.xlu1 %2426 }
 0x384   : > { %v2434_v28 = vunpack.i.h.bf16 %v2432_v24  ;;  %v2433_v29 = vunpack.i.l.bf16 %v2432_v24  ;;  %v2429_v30 = vunpack.i.h.bf16 %v2427_v27  ;;  %v2428_v33 = vunpack.i.l.bf16 %v2427_v27 }
 0x386   : > { %v777_v34 = vsel %vm529_vm2, %v2433_v29, %v2434_v28  ;;  %v781_v35 = vsel %vm529_vm2, %v2434_v28, %v2433_v29  ;;  %v769_v36 = vsel %vm520_vm0, %v2429_v30, %v2428_v33  ;;  %v772_v37 = vsel %vm520_vm0, %v2428_v33, %v2429_v30 }
 0x387   : > { %v2442_v38 = vpop.permute.xlu0 %2441  ;;  %v2437_v39 = vpop.permute.xlu1 %2436  ;;  %v782_v40 = vsel %vm3411_vm4, %v772_v37, %v777_v34  ;;  %v783_v41 = vsel %vm3415_vm5, %v769_v36, %v781_v35  ;;  %vm1041_vm0 = vcmask 31744  }
 0x388   : > { %v2444_v42 = vunpack.i.h.bf16 %v2442_v38  ;;  %v2443_v43 = vunpack.i.l.bf16 %v2442_v38  ;;  %v2439_v44 = vunpack.i.h.bf16 %v2437_v39  ;;  %v2438_v45 = vunpack.i.l.bf16 %v2437_v39 }
 0x389   : > { %v825_v46 = vpack.c.bf16 %v782_v40, %v782_v40  ;;  %v2450_v47 = vpack.i.bf16 %v782_v40, %v783_v41  ;;  %v826_v48 = vpack.c.bf16 %v783_v41, %v783_v41  ;;  %v2470_v31 = vpack.i.bf16 %v783_v41, %v782_v40 }
 0x38a   : > { %v758_v50 = vsel %vm504_vm3, %v2444_v42, %v2443_v43  ;;  %v761_v51 = vsel %vm504_vm3, %v2443_v43, %v2444_v42  ;;  %v748_v52 = vsel %vm493_vm1, %v2438_v45, %v2439_v44  ;;  %v752_v25 = vsel %vm493_vm1, %v2439_v44, %v2438_v45 }
 0x38b   : > { %v874_v53 = vrot.slane %v825_v46, 6  ;;  %2451 = vrot.lane.b32.xlu0 %v2450_v47, %s3013_s23  ;;  %v875_v26 = vrot.slane %v826_v48, 6  ;;  %v3515_v54 = vsel %vm3421_vm6, %v748_v52, %v761_v51  ;;  %v763_v55 = vsel %vm3425_vm7, %v752_v25, %v758_v50  ;;  %v2447_v57 = vpop.permute.xlu1 %2446 }
 0x38c   : > { %v2455_v58 = vpack.i.bf16 %v3515_v54, %v763_v55  ;;  %v2460_v61 = vpack.i.bf16 %v763_v55, %v3515_v54  ;;  %v2449_v3 = vunpack.i.h.bf16 %v2447_v57  ;;  %v2448_v4 = vunpack.i.l.bf16 %v2447_v57 }
 0x38d   : > { %v3522_v63 = vsel %vm884_vm12, %v824_v49, %v875_v26  ;;  %v3526_v56 = vsel %vm884_vm12, %v823_v62, %v874_v53  ;;  %v822_v7 = vpack.c.bf16 %v763_v55, %v763_v55  ;;  %v821_v17 = vpack.c.bf16 %v3515_v54, %v3515_v54 }
 0x38e   : > { %2456 = vrot.lane.b32.xlu1 %v2455_v58, %s3013_s23  ;;  %v802_v5 = vsel %vm548_vm9, %v2449_v3, %v2448_v4  ;;  %v805_v6 = vsel %vm548_vm9, %v2448_v4, %v2449_v3 }
 0x38f   : > { %2461 = vrot.lane.b32.xlu0 %v2460_v61, %s3014_s2  ;;  %v806_v9 = vpack.c.bf16 %v805_v6, %v805_v6  ;;  %v807_v10 = vpack.c.bf16 %v802_v5, %v802_v5  ;;  %v871_v16 = vrot.slane %v822_v7, 2  ;;  %v870_v54 = vrot.slane %v821_v17, 2 }
 0x391   : > { %v862_v23 = vrot.slane %v806_v9, 6  ;;  %v863_v24 = vrot.slane %v807_v10, 6  ;;  %v469_v9 = vld [vmem:[#allocation8] sm:$0x3] }
 0x392   : > { %2466 = vrot.lane.b32.xlu1 %v2430_v22, %s3014_s2 }
 0x393   : > { %2471 = vrot.lane.b32.xlu0 %v2470_v31, %s3014_s2 }
 0x396   : > { %919 = vperm.xlu1 %2475, %v3466_v60  }
 0x397   : > { %1029 = vperm.xlu0 %2476, %v3466_v60  }
 0x3fd   : > { %v2452_v8 = vpop.permute.xlu0 %2451 }
 0x3fe   : > { %v2454_v11 = vunpack.i.h.bf16 %v2452_v8  ;;  %v2453_v12 = vunpack.i.l.bf16 %v2452_v8  ;;  %v974_v8 = vpack.c.bf16 %v3392_v1, %v3392_v1  ;;  %v3018_v1 = vmov 4  }
 0x3ff   : > { %2477 = vset.pattern.permute.xlu1 %v3018_v1 }
 0x400   : > { %v815_v13 = vsel %vm548_vm9, %v2454_v11, %v2453_v12  ;;  %v818_v14 = vsel %vm548_vm9, %v2453_v12, %v2454_v11  ;;  %v2457_v15 = vpop.permute.xlu1 %2456  ;;  %v470_v11 = vld [vmem:[#allocation10] sm:$0x3]  ;;  %1105 = vperm.xlu1 %2477, %v3466_v60  }
 0x401   : > { %v819_v18 = vpack.c.bf16 %v818_v14, %v818_v14  ;;  %v820_v19 = vpack.c.bf16 %v815_v13, %v815_v13  ;;  %v2459_v20 = vunpack.i.h.bf16 %v2457_v15  ;;  %v2458_v21 = vunpack.i.l.bf16 %v2457_v15  ;;  %v2462_v22 = vpop.permute.xlu0 %2461 }
 0x402   : > { %v2464_v27 = vunpack.i.h.bf16 %v2462_v22  ;;  %v2463_v28 = vunpack.i.l.bf16 %v2462_v22 }
 0x403   : > { %v866_v29 = vrot.slane %v819_v18, 4  ;;  %v867_v30 = vrot.slane %v820_v19, 4  ;;  %v791_v33 = vsel %vm548_vm9, %v2459_v20, %v2458_v21  ;;  %v794_v34 = vsel %vm548_vm9, %v2458_v21, %v2459_v20 }
 0x404   : > { %v795_v35 = vpack.c.bf16 %v794_v34, %v794_v34  ;;  %v796_v36 = vpack.c.bf16 %v791_v33, %v791_v33  ;;  %v831_v37 = vsel %vm589_vm10, %v2463_v28, %v2464_v27  ;;  %v835_v38 = vsel %vm589_vm10, %v2464_v27, %v2463_v28  ;;  %v2467_v39 = vpop.permute.xlu1 %2466  ;;  %v2481_v34 = vld [vmem:[#allocation13] sm:$0x3f]  }
 0x405   : > { %v836_v40 = vpack.c.bf16 %v831_v37, %v831_v37  ;;  %v837_v41 = vpack.c.bf16 %v835_v38, %v835_v38  ;;  %v2469_v42 = vunpack.i.h.bf16 %v2467_v39  ;;  %v2468_v43 = vunpack.i.l.bf16 %v2467_v39  ;;  %v2472_v44 = vpop.permute.xlu0 %2471 }
 0x406   : > { %v2474_v45 = vunpack.i.h.bf16 %v2472_v44  ;;  %v2473_v46 = vunpack.i.l.bf16 %v2472_v44  ;;  %v890_v47 = vsel %vm884_vm12, %v796_v36, %v863_v24  ;;  %v887_v48 = vsel %vm884_vm12, %v795_v35, %v862_v23 }
 0x407   : > { %v878_v49 = vrot.slane %v836_v40, 4  ;;  %v879_v50 = vrot.slane %v837_v41, 4  ;;  %v842_v51 = vsel %vm589_vm10, %v2468_v43, %v2469_v42  ;;  %v846_v52 = vsel %vm589_vm10, %v2469_v42, %v2468_v43 }
 0x408   : > { %v847_v25 = vpack.c.bf16 %v842_v51, %v842_v51  ;;  %v848_v53 = vpack.c.bf16 %v846_v52, %v846_v52  ;;  %v894_v26 = vsel %vm635_vm8, %v890_v47, %v867_v30  ;;  %v892_v58 = vsel %vm635_vm8, %v887_v48, %v866_v29 }
 0x409   : > { %v900_v55 = vsel %vm895_vm13, %v894_v26, %v871_v16  ;;  %v897_v62 = vsel %vm895_vm13, %v892_v58, %v870_v54  ;;  %v857_v32 = vsel %vm589_vm10, %v2474_v45, %v2473_v46  ;;  %v911_v2 = vsel %vm635_vm8, %v3522_v63, %v879_v50 }
 0x40a   : > { %v882_v61 = vrot.slane %v847_v25, 2  ;;  %932 = vmatprep.subr.bf16.mxu0 %v900_v55  ;;  %v883_v31 = vrot.slane %v848_v53, 2  ;;  %v909_v57 = vsel %vm635_vm8, %v3526_v56, %v878_v49  ;;  %v853_v3 = vsel %vm589_vm10, %v2473_v46, %v2474_v45 }
 0x40b   : > { %933 = vmatpush1.bf16.msra.mxu0 %v897_v62  ;;  %v859_v6 = vpack.c.bf16 %v857_v32, %v857_v32  ;;  %v858_v7 = vpack.c.bf16 %v853_v3, %v853_v3  ;;  %v973_v63 = vpack.c.bf16 %v3390_v0, %v3390_v0  ;;  %v3019_v0 = vmov 3  }
 0x40c   : > { %v916_v4 = vsel %vm895_vm13, %v911_v2, %v883_v31  ;;  %v913_v5 = vsel %vm895_vm13, %v909_v57, %v882_v61  ;;  %2478 = vset.pattern.permute.xlu1 %v3019_v0 }
 0x40d   : > { %934 = vmatprep.subr.bf16.mxu0 %v916_v4  ;;  %v927_v56 = vsel %vm884_vm12, %v858_v7, 0  ;;  %v980_v10 = vsel %vm635_vm8, %v973_v63, 0  ;;  %1095 = vperm.xlu1 %2478, %v3466_v60  }
 0x40f   : > { %935 = vmatpush1.bf16.msra.mxu0 %v913_v5 }
 0x410   : > { %2213 = vmatprep.subr.msk.bf16.mxu0 %vm884_vm12, %v859_v6 }
 0x413   : > { %937 = vmatpush1.bf16.msra.mxu0 %v927_v56 }
 0x414   : > { %2215 = vmatprep.subr.msk.bf16.mxu0 %vm635_vm8, %v974_v8 }
 0x415   : > { %v920_v16 = vpop.permute.xlu1 %919 }
 0x416   : > { %2214 = vmatmul.mubr.msk.bf16.vlgmr.msra.gmra.mrb[4].mxu0 %vm922_vm14, %v469_v9  ;;  %v1030_v20 = vpop.permute.xlu0 %1029 }
 0x417   : > { %986 = vmatpush1.bf16.msra.mxu0 %v980_v10  ;;  %1017 = vmatprep.mubr.bf16.mxu0 %v4205_v59 }
 0x41e   : > { %2216 = vmatmul.mubr.msk.bf16.vlgmr.msra.gmra.mrb[8].mxu0 %vm975_vm15, %v470_v11 }
 0x41f   : > { %1083 = vmatprep.mubr.bf16.mxu0 %v4205_v59 }
 0x47f   : > { %v1106_v35 = vpop.permute.xlu1 %1105 }
 0x480   : > { %v1107_v36 = vrot.slane %v1106_v35, 4 }
 0x48c   : > { %v1096_v37 = vpop.permute.xlu1 %1095 }
 0x4e9   : > { %v966_v12 = vpop.f32.mrb[4].mxu0 }
 0x4ea   : > { %v968_v13 = vpop.f32.mrb[5].mxu0  ;;  %v967_v17 = vadd.f32 %v966_v12, %v920_v16 }
 0x4eb   : > { %v970_v14 = vpop.f32.mrb[6].mxu0  ;;  %v969_v18 = vadd.f32 %v968_v13, %v920_v16 }
 0x4ec   : > { %v971_v15 = vpop.f32.mrb[7].mxu0 }
 0x4f1   : > { %v1019_v19 = vpop.f32.mrb[8].mxu0 }
 0x4f2   : > { %v1026_v21 = vadd.f32 %v1019_v19, %v967_v17  ;;  %v1021_v22 = vpop.f32.mrb[9].mxu0 }
 0x4f3   : > { %v1027_v23 = vadd.f32 %v1021_v22, %v969_v18  ;;  %v1023_v24 = vpop.f32.mrb[10].mxu0 }
 0x4f4   : > { %v3571_v27 = vadd.f32 %v1030_v20, %v1026_v21  ;;  %v1024_v28 = vpop.f32.mrb[11].mxu0 }
 0x4f5   : > { %v3573_v29 = vadd.f32 %v1030_v20, %v1027_v23 }
 0x4f6   : > { %4272 = vst [vmem:[#allocation24_spill] sm:$0xff] %v3571_v27  ;;  %v1034_v60 = vpack.c.bf16 %v3571_v27, %v3571_v27 }
 0x4f7   : > { %4273 = vst [vmem:[#allocation25_spill] sm:$0xff] %v3573_v29  ;;  %v1035_v30 = vpack.c.bf16 %v3573_v29, %v3573_v29 }
 0x4f8   : > { %v1046_v33 = vsel %vm884_vm12, %v1034_v60, 0 }
 0x4f9   : > { %2218 = vmatprep.subr.msk.bf16.mxu0 %vm884_vm12, %v1035_v30 }
 0x4fa   : > { %1052 = vmatpush1.bf16.msra.mxu0 %v1046_v33 }
 0x4fd   : > { %2219 = vmatmul.mubr.msk.bf16.vlgmr.msra.gmra.mrb[12].mxu0 %vm1041_vm0, %v2481_v34 }
 0x5d0   : > { %v1085_v38 = vpop.f32.mrb[12].mxu0 }
 0x5d1   : > { %v1098_v39 = vadd.f32 %v1096_v37, %v1085_v38  ;;  %v1109_v40 = vadd.f32 %v1107_v36, %v1085_v38  ;;  %v1087_v41 = vpop.f32.mrb[13].mxu0 }
 0x5d2   : > { %v1099_v42 = vadd.f32 %v1096_v37, %v1087_v41  ;;  %v1110_v43 = vadd.f32 %v1107_v36, %v1087_v41  ;;  %v3582_v44 = vpop.f32.mrb[14].mxu0 }
 0x5d3   : > { %4274 = vst [vmem:[#allocation26_spill] sm:$0xff] %v3582_v44  ;;  %v1100_v45 = vmul.f32 0.5, %v1098_v39  ;;  %v1111_v46 = vpack.c.bf16 %v1109_v40, %v1109_v40  ;;  %v3584_v47 = vpop.f32.mrb[15].mxu0 }
 0x5d4   : > { %4275 = vst [vmem:[#allocation27_spill] sm:$0xff] %v3584_v47  ;;  %v1112_v48 = vpack.c.bf16 %v1110_v43, %v1110_v43  ;;  %v1101_v49 = vmul.f32 0.5, %v1099_v42 }
 0x5d5   : > { %v1123_v50 = vrot.slane %v1111_v46, 2  ;;  %v1102_v51 = vpack.c.bf16 %v1100_v45, %v1100_v45 }
 0x5d6   : > { %v1124_v52 = vrot.slane %v1112_v48, 2  ;;  %v1103_v25 = vpack.c.bf16 %v1101_v49, %v1101_v49 }
 0x5d7   : > { %1127 = vxpose.xlu0.c.b16.start.end [1/1] (short) %v1123_v50, 128  ;;  %v1208_v53 = vsel %vm884_vm12, %v1102_v51, 0 }
 0x5d8   : > { %1143 = vxpose.xlu1.c.b16.start.end [1/1] (short) %v1124_v52, 128  ;;  %2220 = vmatprep.subr.msk.bf16.mxu1 %vm884_vm12, %v1103_v25 }
 0x5d9   : > { %1214 = vmatpush1.bf16.msra.mxu1 %v1208_v53 }
 0x63d   : > { %v1135_v26 = vpop.trf.xlu0 }
 0x63e   : > { %2221 = vmatmul.mubr.msk.bf16.vlgmr.msra.gmra.mrb[0].mxu1 %vm1041_vm0, %v1135_v26  ;;  %v1151_v2 = vpop.trf.xlu1 }
 0x63f   : > { %1255 = vmatprep.mubr.bf16.mxu1 %v4205_v59 }
 0x641   : > { %v1136_v54 = vpop.trf.xlu0 }
 0x642   : > { %v1152_v57 = vpop.trf.xlu1 }
 0x645   : > { %v1137_v55 = vpop.trf.xlu0 }
 0x646   : > { %2222 = vmatmul.mubr.msk.bf16.gmra.mrb[4].mxu1 %vm1041_vm0, %v1136_v54  ;;  %v1153_v3 = vpop.trf.xlu1 }
 0x647   : > { %1265 = vmatprep.mubr.bf16.mxu1 %v4205_v59 }
 0x649   : > { %v1138_v58 = vpop.trf.xlu0 }
 0x64a   : > { %v1154_v4 = vpop.trf.xlu1 }
 0x64d   : > { %v1139_v61 = vpop.trf.xlu0 }
 0x64e   : > { %2223 = vmatmul.mubr.msk.bf16.gmra.mrb[8].mxu1 %vm1041_vm0, %v1137_v55  ;;  %v1155_v5 = vpop.trf.xlu1 }
 0x64f   : > { %1275 = vmatprep.mubr.bf16.mxu1 %v4205_v59 }
 0x651   : > { %v1140_v62 = vpop.trf.xlu0 }
 0x652   : > { %v1156_v6 = vpop.trf.xlu1 }
 0x655   : > { %v1141_v31 = vpop.trf.xlu0 }
 0x656   : > { %2224 = vmatmul.mubr.msk.bf16.gmra.mrb[12].mxu1 %vm1041_vm0, %v1138_v58  ;;  %v1157_v7 = vpop.trf.xlu1 }
 0x657   : > { %1285 = vmatprep.mubr.bf16.mxu1 %v4205_v59 }
 0x659   : > { %v1142_v32 = vpop.trf.xlu0 }
 0x65a   : > { %v1158_v8 = vpop.trf.xlu1 }
 0x65e   : > { %2225 = vmatmul.mubr.msk.bf16.gmra.mrb[16].mxu1 %vm1041_vm0, %v1139_v61 }
 0x65f   : > { %1295 = vmatprep.mubr.bf16.mxu1 %v4205_v59 }
 0x666   : > { %2226 = vmatmul.mubr.msk.bf16.gmra.mrb[20].mxu1 %vm1041_vm0, %v1140_v62 }
 0x667   : > { %1305 = vmatprep.mubr.bf16.mxu1 %v4205_v59 }
 0x66e   : > { %2227 = vmatmul.mubr.msk.bf16.gmra.mrb[24].mxu1 %vm1041_vm0, %v1141_v31 }
 0x66f   : > { %1315 = vmatprep.mubr.bf16.mxu1 %v4205_v59 }
 0x676   : > { %2228 = vmatmul.mubr.msk.bf16.gmra.mrb[28].mxu1 %vm1041_vm0, %v1142_v32 }
 0x677   : > { %1325 = vmatprep.mubr.bf16.mxu1 %v4205_v59 }
 0x67e   : > { %2229 = vmatmul.mubr.msk.bf16.gmra.mrb[32].mxu1 %vm1041_vm0, %v1151_v2 }
 0x67f   : > { %1335 = vmatprep.mubr.bf16.mxu1 %v4205_v59 }
 0x686   : > { %2230 = vmatmul.mubr.msk.bf16.gmra.mrb[36].mxu1 %vm1041_vm0, %v1152_v57 }
 0x687   : > { %1345 = vmatprep.mubr.bf16.mxu1 %v4205_v59 }
 0x68e   : > { %2231 = vmatmul.mubr.msk.bf16.gmra.mrb[40].mxu1 %vm1041_vm0, %v1153_v3 }
 0x68f   : > { %1355 = vmatprep.mubr.bf16.mxu1 %v4205_v59 }
 0x696   : > { %2232 = vmatmul.mubr.msk.bf16.gmra.mrb[44].mxu1 %vm1041_vm0, %v1154_v4 }
 0x697   : > { %1365 = vmatprep.mubr.bf16.mxu1 %v4205_v59 }
 0x69e   : > { %2233 = vmatmul.mubr.msk.bf16.gmra.mrb[48].mxu1 %vm1041_vm0, %v1155_v5 }
 0x69f   : > { %1375 = vmatprep.mubr.bf16.mxu1 %v4205_v59 }
 0x6a6   : > { %2234 = vmatmul.mubr.msk.bf16.gmra.mrb[52].mxu1 %vm1041_vm0, %v1156_v6 }
 0x6a7   : > { %1385 = vmatprep.mubr.bf16.mxu1 %v4205_v59 }
 0x6ae   : > { %2235 = vmatmul.mubr.msk.bf16.gmra.mrb[56].mxu1 %vm1041_vm0, %v1157_v7 }
 0x6af   : > { %1395 = vmatprep.mubr.bf16.mxu1 %v4205_v59 }
 0x6b6   : > { %2236 = vmatmul.mubr.msk.bf16.gmra.mrb[60].mxu1 %vm1041_vm0, %v1158_v8 }
 0x711   : > { %v3619_v63 = vpop.f32.mrb[0].mxu1 }
 0x712   : > { %v3621_v56 = vpop.f32.mrb[1].mxu1 }
 0x713   : > { %v3623_v9 = vpop.f32.mrb[2].mxu1  ;;  %v1406_v10 = vmax.f32 %v3619_v63, %v3621_v56 }
 0x714   : > { %v3627_v11 = vpop.f32.mrb[3].mxu1 }
 0x715   : > { %1407 = vmax.xlane.f32.xlu0 %v1406_v10  ;;  %v1409_v1 = vmax.f32 %v3623_v9, %v3627_v11 }
 0x717   : > { %1410 = vmax.xlane.f32.xlu1 %v1409_v1 }
 0x719   : > { %v3631_v0 = vpop.f32.mrb[4].mxu1 }
 0x71a   : > { %v3633_v12 = vpop.f32.mrb[5].mxu1 }
 0x71b   : > { %v3635_v13 = vpop.f32.mrb[6].mxu1  ;;  %v1412_v14 = vmax.f32 %v3631_v0, %v3633_v12 }
 0x71c   : > { %v3639_v15 = vpop.f32.mrb[7].mxu1 }
 0x71d   : > { %1413 = vmax.xlane.f32.xlu0 %v1412_v14  ;;  %v1415_v16 = vmax.f32 %v3635_v13, %v3639_v15 }
 0x721   : > { %1416 = vmax.xlane.f32.xlu0 %v1415_v16  ;;  %v3643_v17 = vpop.f32.mrb[8].mxu1 }
 0x722   : > { %v3645_v18 = vpop.f32.mrb[9].mxu1 }
 0x723   : > { %v3647_v19 = vpop.f32.mrb[10].mxu1  ;;  %v1418_v20 = vmax.f32 %v3643_v17, %v3645_v18 }
 0x724   : > { %v3651_v21 = vpop.f32.mrb[11].mxu1 }
 0x725   : > { %1419 = vmax.xlane.f32.xlu1 %v1418_v20  ;;  %v1421_v22 = vmax.f32 %v3647_v19, %v3651_v21 }
 0x727   : > { %1422 = vmax.xlane.f32.xlu0 %v1421_v22 }
 0x729   : > { %v3655_v23 = vpop.f32.mrb[12].mxu1 }
 0x72a   : > { %v3657_v24 = vpop.f32.mrb[13].mxu1 }
 0x72b   : > { %v3659_v28 = vpop.f32.mrb[14].mxu1  ;;  %v1424_v60 = vmax.f32 %v3655_v23, %v3657_v24 }
 0x72c   : > { %v3663_v30 = vpop.f32.mrb[15].mxu1 }
 0x72d   : > { %1425 = vmax.xlane.f32.xlu1 %v1424_v60  ;;  %v1427_v33 = vmax.f32 %v3659_v28, %v3663_v30 }
 0x72f   : > { %1428 = vmax.xlane.f32.xlu0 %v1427_v33 }
 0x731   : > { %v3667_v34 = vpop.f32.mrb[16].mxu1 }
 0x732   : > { %v3669_v35 = vpop.f32.mrb[17].mxu1 }
 0x733   : > { %v3671_v36 = vpop.f32.mrb[18].mxu1  ;;  %v1430_v37 = vmax.f32 %v3667_v34, %v3669_v35 }
 0x734   : > { %v3675_v38 = vpop.f32.mrb[19].mxu1 }
 0x735   : > { %1431 = vmax.xlane.f32.xlu1 %v1430_v37  ;;  %v1433_v39 = vmax.f32 %v3671_v36, %v3675_v38 }
 0x737   : > { %1434 = vmax.xlane.f32.xlu0 %v1433_v39 }
 0x739   : > { %v3679_v40 = vpop.f32.mrb[20].mxu1 }
 0x73a   : > { %v3681_v41 = vpop.f32.mrb[21].mxu1 }
 0x73b   : > { %v3683_v42 = vpop.f32.mrb[22].mxu1  ;;  %v1436_v43 = vmax.f32 %v3679_v40, %v3681_v41 }
 0x73c   : > { %v3687_v45 = vpop.f32.mrb[23].mxu1 }
 0x73d   : > { %1437 = vmax.xlane.f32.xlu1 %v1436_v43  ;;  %v1439_v46 = vmax.f32 %v3683_v42, %v3687_v45 }
 0x73f   : > { %1440 = vmax.xlane.f32.xlu0 %v1439_v46 }
 0x741   : > { %v3691_v48 = vpop.f32.mrb[24].mxu1 }
 0x742   : > { %v3693_v49 = vpop.f32.mrb[25].mxu1 }
 0x743   : > { %v3695_v50 = vpop.f32.mrb[26].mxu1  ;;  %v1442_v51 = vmax.f32 %v3691_v48, %v3693_v49 }
 0x744   : > { %v3699_v52 = vpop.f32.mrb[27].mxu1 }
 0x745   : > { %1443 = vmax.xlane.f32.xlu1 %v1442_v51  ;;  %v1445_v25 = vmax.f32 %v3695_v50, %v3699_v52 }
 0x747   : > { %1446 = vmax.xlane.f32.xlu0 %v1445_v25 }
 0x749   : > { %v3703_v53 = vpop.f32.mrb[28].mxu1 }
 0x74a   : > { %v3705_v26 = vpop.f32.mrb[29].mxu1 }
 0x74b   : > { %v3707_v54 = vpop.f32.mrb[30].mxu1  ;;  %v1448_v55 = vmax.f32 %v3703_v53, %v3705_v26 }
 0x74c   : > { %v3711_v58 = vpop.f32.mrb[31].mxu1 }
 0x74d   : > { %1449 = vmax.xlane.f32.xlu1 %v1448_v55  ;;  %v1451_v61 = vmax.f32 %v3707_v54, %v3711_v58 }
 0x74f   : > { %1452 = vmax.xlane.f32.xlu0 %v1451_v61 }
 0x751   : > { %v3715_v62 = vpop.f32.mrb[32].mxu1 }
 0x752   : > { %v3717_v31 = vpop.f32.mrb[33].mxu1 }
 0x753   : > { %v3719_v32 = vpop.f32.mrb[34].mxu1  ;;  %v1454_v2 = vmax.f32 %v3715_v62, %v3717_v31 }
 0x754   : > { %v3723_v57 = vpop.f32.mrb[35].mxu1 }
 0x755   : > { %1455 = vmax.xlane.f32.xlu1 %v1454_v2  ;;  %v1457_v3 = vmax.f32 %v3719_v32, %v3723_v57 }
 0x757   : > { %1458 = vmax.xlane.f32.xlu0 %v1457_v3 }
 0x759   : > { %v3727_v4 = vpop.f32.mrb[36].mxu1 }
 0x75a   : > { %v3729_v5 = vpop.f32.mrb[37].mxu1 }
 0x75b   : > { %v3731_v6 = vpop.f32.mrb[38].mxu1  ;;  %v1460_v7 = vmax.f32 %v3727_v4, %v3729_v5 }
 0x75c   : > { %v3735_v8 = vpop.f32.mrb[39].mxu1 }
 0x75d   : > { %1461 = vmax.xlane.f32.xlu1 %v1460_v7  ;;  %v1463_v10 = vmax.f32 %v3731_v6, %v3735_v8 }
 0x75f   : > { %1464 = vmax.xlane.f32.xlu0 %v1463_v10 }
 0x761   : > { %v3739_v1 = vpop.f32.mrb[40].mxu1 }
 0x762   : > { %v3741_v14 = vpop.f32.mrb[41].mxu1 }
 0x763   : > { %v3743_v16 = vpop.f32.mrb[42].mxu1  ;;  %v1466_v20 = vmax.f32 %v3739_v1, %v3741_v14 }
 0x764   : > { %v3747_v22 = vpop.f32.mrb[43].mxu1 }
 0x765   : > { %1467 = vmax.xlane.f32.xlu1 %v1466_v20  ;;  %v1469_v60 = vmax.f32 %v3743_v16, %v3747_v22 }
 0x767   : > { %1470 = vmax.xlane.f32.xlu0 %v1469_v60 }
 0x769   : > { %v3751_v33 = vpop.f32.mrb[44].mxu1 }
 0x76a   : > { %v3753_v37 = vpop.f32.mrb[45].mxu1 }
 0x76b   : > { %v3755_v39 = vpop.f32.mrb[46].mxu1  ;;  %v1472_v43 = vmax.f32 %v3751_v33, %v3753_v37 }
 0x76c   : > { %v3759_v46 = vpop.f32.mrb[47].mxu1 }
 0x76d   : > { %1473 = vmax.xlane.f32.xlu1 %v1472_v43  ;;  %v1475_v51 = vmax.f32 %v3755_v39, %v3759_v46 }
 0x76f   : > { %1476 = vmax.xlane.f32.xlu0 %v1475_v51 }
 0x771   : > { %v3763_v25 = vpop.f32.mrb[48].mxu1 }
 0x772   : > { %v3765_v55 = vpop.f32.mrb[49].mxu1 }
 0x773   : > { %v3767_v61 = vpop.f32.mrb[50].mxu1  ;;  %v1478_v2 = vmax.f32 %v3763_v25, %v3765_v55 }
 0x774   : > { %4276 = vst [vmem:[#allocation28_spill] sm:$0xff] %v3767_v61  ;;  %v3771_v3 = vpop.f32.mrb[51].mxu1 }
 0x775   : > { %4277 = vst [vmem:[#allocation29_spill] sm:$0xff] %v3771_v3  ;;  %1479 = vmax.xlane.f32.xlu1 %v1478_v2  ;;  %v1481_v7 = vmax.f32 %v3767_v61, %v3771_v3 }
 0x777   : > { %1482 = vmax.xlane.f32.xlu0 %v1481_v7 }
 0x779   : > { %v3775_v10 = vpop.f32.mrb[52].mxu1 }
 0x77a   : > { %4278 = vst [vmem:[#allocation30_spill] sm:$0xff] %v3775_v10  ;;  %v3777_v20 = vpop.f32.mrb[53].mxu1 }
 0x77b   : > { %4279 = vst [vmem:[#allocation31_spill] sm:$0xff] %v3777_v20  ;;  %v3779_v60 = vpop.f32.mrb[54].mxu1  ;;  %v1484_v43 = vmax.f32 %v3775_v10, %v3777_v20 }
 0x77c   : > { %4280 = vst [vmem:[#allocation32_spill] sm:$0xff] %v3779_v60  ;;  %v3783_v51 = vpop.f32.mrb[55].mxu1 }
 0x77d   : > { %4281 = vst [vmem:[#allocation33_spill] sm:$0xff] %v3783_v51  ;;  %1485 = vmax.xlane.f32.xlu1 %v1484_v43  ;;  %v1487_v59 = vmax.f32 %v3779_v60, %v3783_v51 }
 0x77f   : > { %1488 = vmax.xlane.f32.xlu0 %v1487_v59 }
 0x781   : > { %v3787_v2 = vpop.f32.mrb[56].mxu1 }
 0x782   : > { %4282 = vst [vmem:[#allocation34_spill] sm:$0xff] %v3787_v2  ;;  %v3789_v29 = vpop.f32.mrb[57].mxu1 }
 0x783   : > { %4283 = vst [vmem:[#allocation35_spill] sm:$0xff] %v3789_v29  ;;  %v3791_v7 = vpop.f32.mrb[58].mxu1  ;;  %v1490_v27 = vmax.f32 %v3787_v2, %v3789_v29 }
 0x784   : > { %4284 = vst [vmem:[#allocation36_spill] sm:$0xff] %v3791_v7  ;;  %v3795_v44 = vpop.f32.mrb[59].mxu1 }
 0x785   : > { %4285 = vst [vmem:[#allocation37_spill] sm:$0xff] %v3795_v44  ;;  %1491 = vmax.xlane.f32.xlu1 %v1490_v27  ;;  %v1493_v47 = vmax.f32 %v3791_v7, %v3795_v44 }
 0x787   : > { %1494 = vmax.xlane.f32.xlu0 %v1493_v47 }
 0x789   : > { %v3799_v43 = vpop.f32.mrb[60].mxu1 }
 0x78a   : > { %4286 = vst [vmem:[#allocation38_spill] sm:$0xff] %v3799_v43  ;;  %v3801_v51 = vpop.f32.mrb[61].mxu1 }
 0x78b   : > { %4287 = vst [vmem:[#allocation39_spill] sm:$0xff] %v3801_v51  ;;  %v3803_v59 = vpop.f32.mrb[62].mxu1  ;;  %v1496_v60 = vmax.f32 %v3799_v43, %v3801_v51 }
 0x78c   : > { %v3807_v20 = vpop.f32.mrb[63].mxu1 }
 0x78d   : > { %4288 = vst [vmem:[#allocation40_spill] sm:$0xff] %v3807_v20  ;;  %v1499_v29 = vmax.f32 %v3803_v59, %v3807_v20  ;;  %1497 = vmax.xlane.f32.xlu1 %v1496_v60 }
 0x78f   : > { %1500 = vmax.xlane.f32.xlu0 %v1499_v29 }
 0x7a2   : > { %v1408_v27 = vpop.xlane.xlu0 %1407 }
 0x7a3   : > { %v1502_v44 = vsub.f32 %v3619_v63, %v1408_v27  ;;  %v1503_v47 = vsub.f32 %v3621_v56, %v1408_v27 }
 0x7a4   : > { %v1411_v7 = vpop.xlane.xlu1 %1410 }
 0x7a5   : > { %v1566_v2 = vmul.f32 1.442695, %v1502_v44  ;;  %v1568_v10 = vmul.f32 1.442695, %v1503_v47  ;;  %v1504_v3 = vsub.f32 %v3623_v9, %v1411_v7  ;;  %v1505_v61 = vsub.f32 %v3627_v11, %v1411_v7 }
 0x7a6   : > { %v3020_v11 = vmov 5  }
 0x7a7   : > { %2490 = vpow2.f32 %v1566_v2  ;;  %v1570_v51 = vmul.f32 1.442695, %v1504_v3  ;;  %v1572_v43 = vmul.f32 1.442695, %v1505_v61  ;;  %2479 = vset.pattern.permute.xlu1 %v3020_v11 }
 0x7a8   : > { %2492 = vpow2.f32 %v1568_v10 }
 0x7a9   : > { %2494 = vpow2.f32 %v1570_v51 }
 0x7aa   : > { %2496 = vpow2.f32 %v1572_v43  ;;  %v1414_v60 = vpop.xlane.xlu0 %1413 }
 0x7ab   : > { %v1506_v29 = vsub.f32 %v3631_v0, %v1414_v60  ;;  %v1507_v63 = vsub.f32 %v3633_v12, %v1414_v60 }
 0x7ad   : > { %v1574_v20 = vmul.f32 1.442695, %v1506_v29  ;;  %v1576_v56 = vmul.f32 1.442695, %v1507_v63 }
 0x7ae   : > { %v1417_v27 = vpop.xlane.xlu0 %1416 }
 0x7af   : > { %2498 = vpow2.f32 %v1574_v20  ;;  %v1508_v44 = vsub.f32 %v3635_v13, %v1417_v27  ;;  %v1509_v9 = vsub.f32 %v3639_v15, %v1417_v27 }
 0x7b0   : > { %2500 = vpow2.f32 %v1576_v56 }
 0x7b1   : > { %v3819_v61 = vpop.eup %2490  ;;  %v1578_v3 = vmul.f32 1.442695, %v1508_v44  ;;  %v1580_v10 = vmul.f32 1.442695, %v1509_v9 }
 0x7b2   : > { %v3821_v51 = vpop.eup %2492  ;;  %v1420_v0 = vpop.xlane.xlu1 %1419 }
 0x7b3   : > { %v3823_v2 = vpop.eup %2494  ;;  %2502 = vpow2.f32 %v1578_v3  ;;  %v1510_v12 = vsub.f32 %v3643_v17, %v1420_v0  ;;  %v1511_v20 = vsub.f32 %v3645_v18, %v1420_v0  ;;  %v1694_v13 = vadd.f32 %v3821_v51, %v3819_v61 }
 0x7b4   : > { %v3829_v15 = vpop.eup %2496  ;;  %2504 = vpow2.f32 %v1580_v10  ;;  %v1423_v7 = vpop.xlane.xlu0 %1422 }
 0x7b5   : > { %v1582_v43 = vmul.f32 1.442695, %v1510_v12  ;;  %v1584_v47 = vmul.f32 1.442695, %v1511_v20  ;;  %v1512_v60 = vsub.f32 %v3647_v19, %v1423_v7  ;;  %v1513_v29 = vsub.f32 %v3651_v21, %v1423_v7  ;;  %1695 = vadd.xlane.f32.xlu1 %v1694_v13 }
 0x7b6   : > { %v1697_v63 = vadd.f32 %v3829_v15, %v3823_v2 }
 0x7b7   : > { %2506 = vpow2.f32 %v1582_v43  ;;  %v1586_v17 = vmul.f32 1.442695, %v1512_v60  ;;  %v1588_v18 = vmul.f32 1.442695, %v1513_v29 }
 0x7b8   : > { %2508 = vpow2.f32 %v1584_v47  ;;  %1698 = vadd.xlane.f32.xlu0 %v1697_v63 }
 0x7b9   : > { %v3835_v56 = vpop.eup %2498  ;;  %2510 = vpow2.f32 %v1586_v17 }
 0x7ba   : > { %v3837_v27 = vpop.eup %2500  ;;  %2512 = vpow2.f32 %v1588_v18  ;;  %v1426_v44 = vpop.xlane.xlu1 %1425 }
 0x7bb   : > { %v1514_v19 = vsub.f32 %v3655_v23, %v1426_v44  ;;  %v1515_v21 = vsub.f32 %v3657_v24, %v1426_v44  ;;  %v1700_v9 = vadd.f32 %v3837_v27, %v3835_v56 }
 0x7bc   : > { %v1429_v11 = vpop.xlane.xlu0 %1428 }
 0x7bd   : > { %v3843_v3 = vpop.eup %2502  ;;  %v1590_v10 = vmul.f32 1.442695, %v1514_v19  ;;  %v1592_v0 = vmul.f32 1.442695, %v1515_v21  ;;  %v1516_v12 = vsub.f32 %v3659_v28, %v1429_v11  ;;  %v1517_v20 = vsub.f32 %v3663_v30, %v1429_v11  ;;  %1701 = vadd.xlane.f32.xlu1 %v1700_v9 }
 0x7be   : > { %v3847_v13 = vpop.eup %2504 }
 0x7bf   : > { %2514 = vpow2.f32 %v1590_v10  ;;  %v1594_v7 = vmul.f32 1.442695, %v1516_v12  ;;  %v1596_v23 = vmul.f32 1.442695, %v1517_v20  ;;  %v1703_v24 = vadd.f32 %v3847_v13, %v3843_v3 }
 0x7c0   : > { %2516 = vpow2.f32 %v1592_v0 }
 0x7c1   : > { %v3851_v43 = vpop.eup %2506  ;;  %2518 = vpow2.f32 %v1594_v7  ;;  %1704 = vadd.xlane.f32.xlu0 %v1703_v24 }
 0x7c2   : > { %v3853_v47 = vpop.eup %2508  ;;  %2520 = vpow2.f32 %v1596_v23  ;;  %v1432_v28 = vpop.xlane.xlu1 %1431 }
 0x7c3   : > { %v3855_v60 = vpop.eup %2510  ;;  %v1518_v30 = vsub.f32 %v3667_v34, %v1432_v28  ;;  %v1519_v29 = vsub.f32 %v3669_v35, %v1432_v28  ;;  %v1706_v63 = vadd.f32 %v3853_v47, %v3851_v43 }
 0x7c4   : > { %v3861_v17 = vpop.eup %2512  ;;  %v1435_v18 = vpop.xlane.xlu0 %1434 }
 0x7c5   : > { %v1598_v44 = vmul.f32 1.442695, %v1518_v30  ;;  %v1600_v19 = vmul.f32 1.442695, %v1519_v29  ;;  %v1520_v21 = vsub.f32 %v3671_v36, %v1435_v18  ;;  %v1521_v9 = vsub.f32 %v3675_v38, %v1435_v18  ;;  %1707 = vadd.xlane.f32.xlu1 %v1706_v63 }
 0x7c6   : > { %v1709_v11 = vadd.f32 %v3861_v17, %v3855_v60 }
 0x7c7   : > { %2522 = vpow2.f32 %v1598_v44  ;;  %v1602_v34 = vmul.f32 1.442695, %v1520_v21  ;;  %v1604_v10 = vmul.f32 1.442695, %v1521_v9 }
 0x7c8   : > { %2524 = vpow2.f32 %v1600_v19  ;;  %1710 = vadd.xlane.f32.xlu0 %v1709_v11 }
 0x7c9   : > { %v3867_v35 = vpop.eup %2514  ;;  %2526 = vpow2.f32 %v1602_v34 }
 0x7ca   : > { %v3869_v0 = vpop.eup %2516  ;;  %2528 = vpow2.f32 %v1604_v10  ;;  %v1438_v12 = vpop.xlane.xlu1 %1437 }
 0x7cb   : > { %v3871_v20 = vpop.eup %2518  ;;  %v1522_v36 = vsub.f32 %v3679_v40, %v1438_v12  ;;  %v1523_v38 = vsub.f32 %v3681_v41, %v1438_v12  ;;  %v1712_v7 = vadd.f32 %v3869_v0, %v3867_v35 }
 0x7cc   : > { %v3877_v23 = vpop.eup %2520  ;;  %v1441_v24 = vpop.xlane.xlu0 %1440 }
 0x7cd   : > { %v1606_v28 = vmul.f32 1.442695, %v1522_v36  ;;  %v1608_v30 = vmul.f32 1.442695, %v1523_v38  ;;  %v1524_v29 = vsub.f32 %v3683_v42, %v1441_v24  ;;  %v1525_v63 = vsub.f32 %v3687_v45, %v1441_v24  ;;  %1713 = vadd.xlane.f32.xlu1 %v1712_v7 }
 0x7ce   : > { %v1715_v18 = vadd.f32 %v3877_v23, %v3871_v20 }
 0x7cf   : > { %2530 = vpow2.f32 %v1606_v28  ;;  %v1610_v40 = vmul.f32 1.442695, %v1524_v29  ;;  %v1612_v44 = vmul.f32 1.442695, %v1525_v63 }
 0x7d0   : > { %2532 = vpow2.f32 %v1608_v30  ;;  %1716 = vadd.xlane.f32.xlu0 %v1715_v18 }
 0x7d1   : > { %v3883_v41 = vpop.eup %2522  ;;  %2534 = vpow2.f32 %v1610_v40 }
 0x7d2   : > { %v3885_v19 = vpop.eup %2524  ;;  %2536 = vpow2.f32 %v1612_v44  ;;  %v1444_v21 = vpop.xlane.xlu1 %1443 }
 0x7d3   : > { %v3887_v9 = vpop.eup %2526  ;;  %v1526_v42 = vsub.f32 %v3691_v48, %v1444_v21  ;;  %v1527_v45 = vsub.f32 %v3693_v49, %v1444_v21  ;;  %v1718_v11 = vadd.f32 %v3885_v19, %v3883_v41 }
 0x7d4   : > { %v3893_v34 = vpop.eup %2528  ;;  %v1447_v10 = vpop.xlane.xlu0 %1446 }
 0x7d5   : > { %v1614_v12 = vmul.f32 1.442695, %v1526_v42  ;;  %v1616_v36 = vmul.f32 1.442695, %v1527_v45  ;;  %v1528_v38 = vsub.f32 %v3695_v50, %v1447_v10  ;;  %v1529_v7 = vsub.f32 %v3699_v52, %v1447_v10  ;;  %1719 = vadd.xlane.f32.xlu1 %v1718_v11 }
 0x7d6   : > { %v1721_v24 = vadd.f32 %v3893_v34, %v3887_v9 }
 0x7d7   : > { %2538 = vpow2.f32 %v1614_v12  ;;  %v1618_v48 = vmul.f32 1.442695, %v1528_v38  ;;  %v1620_v28 = vmul.f32 1.442695, %v1529_v7 }
 0x7d8   : > { %2540 = vpow2.f32 %v1616_v36  ;;  %1722 = vadd.xlane.f32.xlu0 %v1721_v24 }
 0x7d9   : > { %v3899_v49 = vpop.eup %2530  ;;  %2542 = vpow2.f32 %v1618_v48 }
 0x7da   : > { %v3901_v30 = vpop.eup %2532  ;;  %2544 = vpow2.f32 %v1620_v28  ;;  %v1450_v29 = vpop.xlane.xlu1 %1449 }
 0x7db   : > { %v3903_v63 = vpop.eup %2534  ;;  %v1530_v50 = vsub.f32 %v3703_v53, %v1450_v29  ;;  %v1531_v52 = vsub.f32 %v3705_v26, %v1450_v29  ;;  %v1724_v18 = vadd.f32 %v3901_v30, %v3899_v49 }
 0x7dc   : > { %v3909_v40 = vpop.eup %2536  ;;  %v1453_v44 = vpop.xlane.xlu0 %1452 }
 0x7dd   : > { %v1622_v21 = vmul.f32 1.442695, %v1530_v50  ;;  %v1624_v42 = vmul.f32 1.442695, %v1531_v52  ;;  %v1532_v45 = vsub.f32 %v3707_v54, %v1453_v44  ;;  %v1533_v11 = vsub.f32 %v3711_v58, %v1453_v44  ;;  %1725 = vadd.xlane.f32.xlu1 %v1724_v18 }
 0x7de   : > { %v1727_v10 = vadd.f32 %v3909_v40, %v3903_v63 }
 0x7df   : > { %2546 = vpow2.f32 %v1622_v21  ;;  %v1626_v53 = vmul.f32 1.442695, %v1532_v45  ;;  %v1628_v12 = vmul.f32 1.442695, %v1533_v11 }
 0x7e0   : > { %2548 = vpow2.f32 %v1624_v42  ;;  %1728 = vadd.xlane.f32.xlu0 %v1727_v10 }
 0x7e1   : > { %v3915_v26 = vpop.eup %2538  ;;  %2550 = vpow2.f32 %v1626_v53 }
 0x7e2   : > { %v3917_v36 = vpop.eup %2540  ;;  %2552 = vpow2.f32 %v1628_v12  ;;  %v1456_v38 = vpop.xlane.xlu1 %1455 }
 0x7e3   : > { %v3919_v7 = vpop.eup %2542  ;;  %v1534_v54 = vsub.f32 %v3715_v62, %v1456_v38  ;;  %v1535_v58 = vsub.f32 %v3717_v31, %v1456_v38  ;;  %v1730_v24 = vadd.f32 %v3917_v36, %v3915_v26 }
 0x7e4   : > { %v3925_v48 = vpop.eup %2544  ;;  %v1459_v28 = vpop.xlane.xlu0 %1458 }
 0x7e5   : > { %v1630_v29 = vmul.f32 1.442695, %v1534_v54  ;;  %v1632_v50 = vmul.f32 1.442695, %v1535_v58  ;;  %v1536_v52 = vsub.f32 %v3719_v32, %v1459_v28  ;;  %v1537_v18 = vsub.f32 %v3723_v57, %v1459_v28  ;;  %1731 = vadd.xlane.f32.xlu1 %v1730_v24 }
 0x7e6   : > { %v1733_v44 = vadd.f32 %v3925_v48, %v3919_v7 }
 0x7e7   : > { %2554 = vpow2.f32 %v1630_v29  ;;  %v1634_v62 = vmul.f32 1.442695, %v1536_v52  ;;  %v1636_v21 = vmul.f32 1.442695, %v1537_v18 }
 0x7e8   : > { %2556 = vpow2.f32 %v1632_v50  ;;  %1734 = vadd.xlane.f32.xlu0 %v1733_v44 }
 0x7e9   : > { %v3931_v31 = vpop.eup %2546  ;;  %2558 = vpow2.f32 %v1634_v62 }
 0x7ea   : > { %v3933_v42 = vpop.eup %2548  ;;  %2560 = vpow2.f32 %v1636_v21  ;;  %v1462_v45 = vpop.xlane.xlu1 %1461 }
 0x7eb   : > { %v3935_v11 = vpop.eup %2550  ;;  %v1538_v32 = vsub.f32 %v3727_v4, %v1462_v45  ;;  %v1539_v57 = vsub.f32 %v3729_v5, %v1462_v45  ;;  %v1736_v10 = vadd.f32 %v3933_v42, %v3931_v31 }
 0x7ec   : > { %v3941_v53 = vpop.eup %2552  ;;  %v1465_v12 = vpop.xlane.xlu0 %1464 }
 0x7ed   : > { %v1638_v38 = vmul.f32 1.442695, %v1538_v32  ;;  %v1640_v54 = vmul.f32 1.442695, %v1539_v57  ;;  %v1540_v58 = vsub.f32 %v3731_v6, %v1465_v12  ;;  %v1541_v24 = vsub.f32 %v3735_v8, %v1465_v12  ;;  %1737 = vadd.xlane.f32.xlu1 %v1736_v10 }
 0x7ee   : > { %v1739_v28 = vadd.f32 %v3941_v53, %v3935_v11 }
 0x7ef   : > { %2562 = vpow2.f32 %v1638_v38  ;;  %v1642_v4 = vmul.f32 1.442695, %v1540_v58  ;;  %v1644_v29 = vmul.f32 1.442695, %v1541_v24 }
 0x7f0   : > { %2564 = vpow2.f32 %v1640_v54  ;;  %1740 = vadd.xlane.f32.xlu0 %v1739_v28 }
 0x7f1   : > { %v3947_v5 = vpop.eup %2554  ;;  %2566 = vpow2.f32 %v1642_v4 }
 0x7f2   : > { %v3949_v50 = vpop.eup %2556  ;;  %2568 = vpow2.f32 %v1644_v29  ;;  %v1468_v52 = vpop.xlane.xlu1 %1467 }
 0x7f3   : > { %v3951_v18 = vpop.eup %2558  ;;  %v1542_v6 = vsub.f32 %v3739_v1, %v1468_v52  ;;  %v1543_v8 = vsub.f32 %v3741_v14, %v1468_v52  ;;  %v1742_v44 = vadd.f32 %v3949_v50, %v3947_v5 }
 0x7f4   : > { %v3957_v62 = vpop.eup %2560  ;;  %v1471_v21 = vpop.xlane.xlu0 %1470 }
 0x7f5   : > { %v1646_v45 = vmul.f32 1.442695, %v1542_v6  ;;  %v1648_v32 = vmul.f32 1.442695, %v1543_v8  ;;  %v1544_v57 = vsub.f32 %v3743_v16, %v1471_v21  ;;  %v1545_v10 = vsub.f32 %v3747_v22, %v1471_v21  ;;  %1743 = vadd.xlane.f32.xlu1 %v1742_v44 }
 0x7f6   : > { %v1745_v12 = vadd.f32 %v3957_v62, %v3951_v18 }
 0x7f7   : > { %2570 = vpow2.f32 %v1646_v45  ;;  %v1650_v1 = vmul.f32 1.442695, %v1544_v57  ;;  %v1652_v38 = vmul.f32 1.442695, %v1545_v10 }
 0x7f8   : > { %2572 = vpow2.f32 %v1648_v32  ;;  %1746 = vadd.xlane.f32.xlu0 %v1745_v12 }
 0x7f9   : > { %v3963_v14 = vpop.eup %2562  ;;  %2574 = vpow2.f32 %v1650_v1 }
 0x7fa   : > { %v3965_v54 = vpop.eup %2564  ;;  %2576 = vpow2.f32 %v1652_v38  ;;  %v1474_v58 = vpop.xlane.xlu1 %1473 }
 0x7fb   : > { %v3967_v24 = vpop.eup %2566  ;;  %v1546_v16 = vsub.f32 %v3751_v33, %v1474_v58  ;;  %v1547_v22 = vsub.f32 %v3753_v37, %v1474_v58  ;;  %v1748_v28 = vadd.f32 %v3965_v54, %v3963_v14 }
 0x7fc   : > { %v3973_v4 = vpop.eup %2568  ;;  %v1477_v29 = vpop.xlane.xlu0 %1476 }
 0x7fd   : > { %v1654_v52 = vmul.f32 1.442695, %v1546_v16  ;;  %v1656_v6 = vmul.f32 1.442695, %v1547_v22  ;;  %v1548_v8 = vsub.f32 %v3755_v39, %v1477_v29  ;;  %v1549_v44 = vsub.f32 %v3759_v46, %v1477_v29  ;;  %1749 = vadd.xlane.f32.xlu1 %v1748_v28  ;;  %v4289_v22 = vld [vmem:[#allocation28_spill] sm:$0xff]  ;;  %v4290_v29 = vld [vmem:[#allocation29_spill] sm:$0xff] }
 0x7fe   : > { %v1751_v21 = vadd.f32 %v3973_v4, %v3967_v24 }
 0x7ff   : > { %2578 = vpow2.f32 %v1654_v52  ;;  %v1658_v33 = vmul.f32 1.442695, %v1548_v8  ;;  %v1660_v45 = vmul.f32 1.442695, %v1549_v44 }
 0x800   : > { %2580 = vpow2.f32 %v1656_v6  ;;  %1752 = vadd.xlane.f32.xlu0 %v1751_v21 }
 0x801   : > { %v3979_v37 = vpop.eup %2570  ;;  %2582 = vpow2.f32 %v1658_v33 }
 0x802   : > { %v3981_v32 = vpop.eup %2572  ;;  %2584 = vpow2.f32 %v1660_v45  ;;  %v1480_v57 = vpop.xlane.xlu1 %1479  ;;  %v4294_v45 = vld [vmem:[#allocation30_spill] sm:$0xff] }
 0x803   : > { %v3983_v10 = vpop.eup %2574  ;;  %v1550_v39 = vsub.f32 %v3763_v25, %v1480_v57  ;;  %v1551_v46 = vsub.f32 %v3765_v55, %v1480_v57  ;;  %v1754_v12 = vadd.f32 %v3981_v32, %v3979_v37 }
 0x804   : > { %v3989_v1 = vpop.eup %2576  ;;  %v1483_v38 = vpop.xlane.xlu0 %1482 }
 0x805   : > { %v1662_v58 = vmul.f32 1.442695, %v1550_v39  ;;  %v1664_v16 = vmul.f32 1.442695, %v1551_v46  ;;  %v1552_v28 = vsub.f32 %v4289_v22, %v1483_v38  ;;  %v1553_v52 = vsub.f32 %v4290_v29, %v1483_v38  ;;  %1755 = vadd.xlane.f32.xlu1 %v1754_v12  ;;  %v4295_v39 = vld [vmem:[#allocation31_spill] sm:$0xff] }
 0x806   : > { %v1757_v6 = vadd.f32 %v3989_v1, %v3983_v10 }
 0x807   : > { %2586 = vpow2.f32 %v1662_v58  ;;  %v1666_v25 = vmul.f32 1.442695, %v1552_v28  ;;  %v1668_v8 = vmul.f32 1.442695, %v1553_v52  ;;  %v4297_v28 = vld [vmem:[#allocation32_spill] sm:$0xff]  ;;  %v4298_v52 = vld [vmem:[#allocation33_spill] sm:$0xff] }
 0x808   : > { %2588 = vpow2.f32 %v1664_v16  ;;  %1758 = vadd.xlane.f32.xlu0 %v1757_v6 }
 0x809   : > { %v3995_v55 = vpop.eup %2578  ;;  %2590 = vpow2.f32 %v1666_v25 }
 0x80a   : > { %4291 = vst [vmem:[#allocation28_spill] sm:$0xff] %v3995_v55  ;;  %v3997_v44 = vpop.eup %2580  ;;  %2592 = vpow2.f32 %v1668_v8  ;;  %v1486_v21 = vpop.xlane.xlu1 %1485 }
 0x80b   : > { %4292 = vst [vmem:[#allocation29_spill] sm:$0xff] %v3997_v44  ;;  %v3999_v33 = vpop.eup %2582  ;;  %v1554_v57 = vsub.f32 %v4294_v45, %v1486_v21  ;;  %v1555_v46 = vsub.f32 %v4295_v39, %v1486_v21  ;;  %v1760_v12 = vadd.f32 %v3997_v44, %v3995_v55  ;;  %v4305_v55 = vld [vmem:[#allocation37_spill] sm:$0xff] }
 0x80c   : > { %4293 = vst [vmem:[#allocation41_spill] sm:$0xff] %v3999_v33  ;;  %v4005_v38 = vpop.eup %2584  ;;  %v1489_v58 = vpop.xlane.xlu0 %1488 }
 0x80d   : > { %4296 = vst [vmem:[#allocation30_spill] sm:$0xff] %v4005_v38  ;;  %v1670_v16 = vmul.f32 1.442695, %v1554_v57  ;;  %v1672_v22 = vmul.f32 1.442695, %v1555_v46  ;;  %v1556_v29 = vsub.f32 %v4297_v28, %v1489_v58  ;;  %v1557_v6 = vsub.f32 %v4298_v52, %v1489_v58  ;;  %1761 = vadd.xlane.f32.xlu1 %v1760_v12  ;;  %v4301_v28 = vld [vmem:[#allocation34_spill] sm:$0xff] }
 0x80e   : > { %v1763_v25 = vadd.f32 %v4005_v38, %v3999_v33  ;;  %v4302_v12 = vld [vmem:[#allocation35_spill] sm:$0xff]  ;;  %v4304_v33 = vld [vmem:[#allocation36_spill] sm:$0xff] }
 0x80f   : > { %2594 = vpow2.f32 %v1670_v16  ;;  %v1674_v8 = vmul.f32 1.442695, %v1556_v29  ;;  %v1676_v45 = vmul.f32 1.442695, %v1557_v6 }
 0x810   : > { %2596 = vpow2.f32 %v1672_v22  ;;  %1764 = vadd.xlane.f32.xlu0 %v1763_v25 }
 0x811   : > { %v4011_v21 = vpop.eup %2586  ;;  %2598 = vpow2.f32 %v1674_v8 }
 0x812   : > { %4299 = vst [vmem:[#allocation31_spill] sm:$0xff] %v4011_v21  ;;  %v4013_v39 = vpop.eup %2588  ;;  %2600 = vpow2.f32 %v1676_v45  ;;  %v1492_v57 = vpop.xlane.xlu1 %1491 }
 0x813   : > { %v4015_v46 = vpop.eup %2590  ;;  %v1558_v58 = vsub.f32 %v4301_v28, %v1492_v57  ;;  %v1559_v52 = vsub.f32 %v4302_v12, %v1492_v57  ;;  %v1766_v16 = vadd.f32 %v4013_v39, %v4011_v21 }
 0x814   : > { %4300 = vst [vmem:[#allocation32_spill] sm:$0xff] %v4015_v46  ;;  %v4021_v29 = vpop.eup %2592  ;;  %v1495_v22 = vpop.xlane.xlu0 %1494 }
 0x815   : > { %4303 = vst [vmem:[#allocation33_spill] sm:$0xff] %v4021_v29  ;;  %v1678_v6 = vmul.f32 1.442695, %v1558_v58  ;;  %v1680_v25 = vmul.f32 1.442695, %v1559_v52  ;;  %v1560_v8 = vsub.f32 %v4304_v33, %v1495_v22  ;;  %v1561_v38 = vsub.f32 %v4305_v55, %v1495_v22  ;;  %1767 = vadd.xlane.f32.xlu1 %v1766_v16  ;;  %v4306_v33 = vld [vmem:[#allocation38_spill] sm:$0xff] }
 0x816   : > { %v1769_v45 = vadd.f32 %v4021_v29, %v4015_v46  ;;  %v4307_v16 = vld [vmem:[#allocation39_spill] sm:$0xff]  ;;  %v4308_v46 = vld [vmem:[#allocation40_spill] sm:$0xff] }
 0x817   : > { %2602 = vpow2.f32 %v1678_v6  ;;  %v1682_v28 = vmul.f32 1.442695, %v1560_v8  ;;  %v1684_v44 = vmul.f32 1.442695, %v1561_v38 }
 0x818   : > { %2604 = vpow2.f32 %v1680_v25  ;;  %1770 = vadd.xlane.f32.xlu0 %v1769_v45 }
 0x819   : > { %v4027_v57 = vpop.eup %2594  ;;  %2606 = vpow2.f32 %v1682_v28 }
 0x81a   : > { %v4029_v12 = vpop.eup %2596  ;;  %2608 = vpow2.f32 %v1684_v44  ;;  %v1498_v58 = vpop.xlane.xlu1 %1497 }
 0x81b   : > { %v4031_v52 = vpop.eup %2598  ;;  %v1562_v55 = vsub.f32 %v4306_v33, %v1498_v58  ;;  %v1563_v22 = vsub.f32 %v4307_v16, %v1498_v58  ;;  %v1772_v6 = vadd.f32 %v4029_v12, %v4027_v57 }
 0x81c   : > { %v4037_v8 = vpop.eup %2600  ;;  %v1501_v38 = vpop.xlane.xlu0 %1500 }
 0x81d   : > { %v1686_v25 = vmul.f32 1.442695, %v1562_v55  ;;  %v1688_v45 = vmul.f32 1.442695, %v1563_v22  ;;  %1773 = vadd.xlane.f32.xlu1 %v1772_v6  ;;  %v1564_v28 = vsub.f32 %v3803_v59, %v1501_v38  ;;  %v1565_v44 = vsub.f32 %v4308_v46, %v1501_v38 }
 0x81e   : > { %v1775_v21 = vadd.f32 %v4037_v8, %v4031_v52 }
 0x81f   : > { %2610 = vpow2.f32 %v1686_v25  ;;  %v1690_v33 = vmul.f32 1.442695, %v1564_v28  ;;  %v1692_v29 = vmul.f32 1.442695, %v1565_v44  ;;  %v4067_v28 = vld [vmem:[#allocation11] sm:$0xf] }
 0x820   : > { %2612 = vpow2.f32 %v1688_v45  ;;  %1776 = vadd.xlane.f32.xlu0 %v1775_v21  ;;  %4316 = vst [vmem:[#allocation42_spill] sm:$0xff] %v4067_v28 }
 0x821   : > { %v4043_v58 = vpop.eup %2602  ;;  %2614 = vpow2.f32 %v1690_v33 }
 0x822   : > { %4309 = vst [vmem:[#allocation34_spill] sm:$0xff] %v4043_v58  ;;  %v4045_v16 = vpop.eup %2604  ;;  %2616 = vpow2.f32 %v1692_v29 }
 0x823   : > { %v4047_v55 = vpop.eup %2606  ;;  %v1778_v59 = vadd.f32 %v4045_v16, %v4043_v58 }
 0x824   : > { %4310 = vst [vmem:[#allocation35_spill] sm:$0xff] %v4047_v55  ;;  %v4051_v46 = vpop.eup %2608 }
 0x825   : > { %4311 = vst [vmem:[#allocation36_spill] sm:$0xff] %v4051_v46  ;;  %1779 = vadd.xlane.f32.xlu1 %v1778_v59  ;;  %v1781_v22 = vadd.f32 %v4051_v46, %v4047_v55 }
 0x827   : > { %1782 = vadd.xlane.f32.xlu0 %v1781_v22 }
 0x829   : > { %v4055_v6 = vpop.eup %2610 }
 0x82a   : > { %4312 = vst [vmem:[#allocation37_spill] sm:$0xff] %v4055_v6  ;;  %v4057_v21 = vpop.eup %2612 }
 0x82b   : > { %4313 = vst [vmem:[#allocation38_spill] sm:$0xff] %v4057_v21  ;;  %v4059_v38 = vpop.eup %2614  ;;  %v1784_v29 = vadd.f32 %v4057_v21, %v4055_v6 }
 0x82c   : > { %4314 = vst [vmem:[#allocation39_spill] sm:$0xff] %v4059_v38  ;;  %v4063_v25 = vpop.eup %2616 }
 0x82d   : > { %4315 = vst [vmem:[#allocation40_spill] sm:$0xff] %v4063_v25  ;;  %1785 = vadd.xlane.f32.xlu1 %v1784_v29  ;;  %v1787_v45 = vadd.f32 %v4063_v25, %v4059_v38 }
 0x82f   : > { %1788 = vadd.xlane.f32.xlu0 %v1787_v45 }
 0x83e   : > { %1114 = vperm.xlu1 %2479, %v4067_v28  }
 0x842   : > { %v1696_v44 = vpop.xlane.xlu1 %1695 }
 0x843   : > { %2618 = vrcp.f32 %v1696_v44 }
 0x845   : > { %v1699_v33 = vpop.xlane.xlu0 %1698 }
 0x846   : > { %2620 = vrcp.f32 %v1699_v33 }
 0x84a   : > { %v1702_v59 = vpop.xlane.xlu1 %1701 }
 0x84b   : > { %2622 = vrcp.f32 %v1702_v59 }
 0x84d   : > { %v2619_v22 = vpop.eup %2618 }
 0x84e   : > { %v1705_v55 = vpop.xlane.xlu0 %1704  ;;  %v1823_v29 = vmul.f32 %v2619_v22, %v3821_v51  ;;  %v1822_v45 = vmul.f32 %v2619_v22, %v3819_v61 }
 0x84f   : > { %2624 = vrcp.f32 %v1705_v55 }
 0x850   : > { %v2621_v6 = vpop.eup %2620 }
 0x851   : > { %v1825_v21 = vmul.f32 %v2621_v6, %v3829_v15  ;;  %v1824_v38 = vmul.f32 %v2621_v6, %v3823_v2 }
 0x852   : > { %v1708_v25 = vpop.xlane.xlu1 %1707 }
 0x853   : > { %v1887_v28 = vpack.c.bf16 %v1825_v21, %v1823_v29  ;;  %v1886_v58 = vpack.c.bf16 %v1824_v38, %v1822_v45  ;;  %2626 = vrcp.f32 %v1708_v25 }
 0x855   : > { %1918 = vmatprep.subr.bf16.mxu0 %v1887_v28  ;;  %v1711_v44 = vpop.xlane.xlu0 %1710  ;;  %v2623_v33 = vpop.eup %2622 }
 0x856   : > { %2628 = vrcp.f32 %v1711_v44  ;;  %1919 = vmatpush1.bf16.msra.mxu0 %v1886_v58  ;;  %v1827_v46 = vmul.f32 %v2623_v33, %v3837_v27  ;;  %v1826_v15 = vmul.f32 %v2623_v33, %v3835_v56 }
 0x859   : > { %v2625_v59 = vpop.eup %2624 }
 0x85a   : > { %v1714_v55 = vpop.xlane.xlu1 %1713  ;;  %v1829_v51 = vmul.f32 %v2625_v59, %v3847_v13  ;;  %v1828_v61 = vmul.f32 %v2625_v59, %v3843_v3 }
 0x85b   : > { %2630 = vrcp.f32 %v1714_v55 }
 0x85c   : > { %v1889_v2 = vpack.c.bf16 %v1829_v51, %v1827_v46  ;;  %v1888_v6 = vpack.c.bf16 %v1828_v61, %v1826_v15 }
 0x85d   : > { %v1717_v21 = vpop.xlane.xlu0 %1716  ;;  %v2627_v38 = vpop.eup %2626 }
 0x85e   : > { %2632 = vrcp.f32 %v1717_v21  ;;  %1920 = vmatprep.subr.bf16.mxu0 %v1889_v2  ;;  %v1831_v25 = vmul.f32 %v2627_v38, %v3853_v47  ;;  %v1830_v27 = vmul.f32 %v2627_v38, %v3851_v43 }
 0x85f   : > { %1921 = vmatpush1.bf16.msra.mxu0 %v1888_v6 }
 0x860   : > { %v2629_v58 = vpop.eup %2628 }
 0x861   : > { %v1833_v28 = vmul.f32 %v2629_v58, %v3861_v17  ;;  %v1832_v13 = vmul.f32 %v2629_v58, %v3855_v60 }
 0x862   : > { %v1720_v56 = vpop.xlane.xlu1 %1719 }
 0x863   : > { %v1891_v22 = vpack.c.bf16 %v1833_v28, %v1831_v25  ;;  %v1890_v3 = vpack.c.bf16 %v1832_v13, %v1830_v27  ;;  %2634 = vrcp.f32 %v1720_v56 }
 0x865   : > { %1922 = vmatprep.subr.bf16.mxu0 %v1891_v22  ;;  %v1723_v46 = vpop.xlane.xlu0 %1722  ;;  %v2631_v29 = vpop.eup %2630 }
 0x866   : > { %2636 = vrcp.f32 %v1723_v46  ;;  %1923 = vmatpush1.bf16.msra.mxu0 %v1890_v3  ;;  %v1835_v44 = vmul.f32 %v2631_v29, %v3869_v0  ;;  %v1834_v17 = vmul.f32 %v2631_v29, %v3867_v35 }
 0x868   : > { %v2633_v45 = vpop.eup %2632 }
 0x869   : > { %v1837_v47 = vmul.f32 %v2633_v45, %v3877_v23  ;;  %v1836_v43 = vmul.f32 %v2633_v45, %v3871_v20 }
 0x86a   : > { %v1726_v33 = vpop.xlane.xlu1 %1725 }
 0x86b   : > { %v1893_v60 = vpack.c.bf16 %v1837_v47, %v1835_v44  ;;  %v1892_v59 = vpack.c.bf16 %v1836_v43, %v1834_v17  ;;  %2638 = vrcp.f32 %v1726_v33 }
 0x86d   : > { %1924 = vmatprep.subr.bf16.mxu0 %v1893_v60  ;;  %v1729_v55 = vpop.xlane.xlu0 %1728  ;;  %v2635_v51 = vpop.eup %2634 }
 0x86e   : > { %2640 = vrcp.f32 %v1729_v55  ;;  %1925 = vmatpush1.bf16.msra.mxu0 %v1892_v59  ;;  %v1839_v61 = vmul.f32 %v2635_v51, %v3885_v19  ;;  %v1838_v23 = vmul.f32 %v2635_v51, %v3883_v41 }
 0x870   : > { %v2637_v15 = vpop.eup %2636 }
 0x871   : > { %v1841_v0 = vmul.f32 %v2637_v15, %v3893_v34  ;;  %v1840_v35 = vmul.f32 %v2637_v15, %v3887_v9 }
 0x872   : > { %v1732_v2 = vpop.xlane.xlu1 %1731 }
 0x873   : > { %v1895_v20 = vpack.c.bf16 %v1841_v0, %v1839_v61  ;;  %v1894_v6 = vpack.c.bf16 %v1840_v35, %v1838_v23  ;;  %2642 = vrcp.f32 %v1732_v2 }
 0x875   : > { %1926 = vmatprep.subr.bf16.mxu0 %v1895_v20  ;;  %v1735_v21 = vpop.xlane.xlu0 %1734  ;;  %v2639_v38 = vpop.eup %2638 }
 0x876   : > { %2644 = vrcp.f32 %v1735_v21  ;;  %1927 = vmatpush1.bf16.msra.mxu0 %v1894_v6  ;;  %v1843_v25 = vmul.f32 %v2639_v38, %v3901_v30  ;;  %v1842_v34 = vmul.f32 %v2639_v38, %v3899_v49 }
 0x878   : > { %v2641_v58 = vpop.eup %2640 }
 0x879   : > { %v1845_v19 = vmul.f32 %v2641_v58, %v3909_v40  ;;  %v1844_v41 = vmul.f32 %v2641_v58, %v3903_v63 }
 0x87a   : > { %v1738_v28 = vpop.xlane.xlu1 %1737 }
 0x87b   : > { %v1897_v9 = vpack.c.bf16 %v1845_v19, %v1843_v25  ;;  %v1896_v27 = vpack.c.bf16 %v1844_v41, %v1842_v34  ;;  %2646 = vrcp.f32 %v1738_v28 }
 0x87d   : > { %1928 = vmatprep.subr.bf16.mxu0 %v1897_v9  ;;  %v1741_v13 = vpop.xlane.xlu0 %1740  ;;  %v2643_v56 = vpop.eup %2642 }
 0x87e   : > { %2648 = vrcp.f32 %v1741_v13  ;;  %1929 = vmatpush1.bf16.msra.mxu0 %v1896_v27  ;;  %v1847_v3 = vmul.f32 %v2643_v56, %v3917_v36  ;;  %v1846_v40 = vmul.f32 %v2643_v56, %v3915_v26  ;;  %v4317_v27 = vld [vmem:[#allocation29_spill] sm:$0xff]  ;;  %v4318_v56 = vld [vmem:[#allocation30_spill] sm:$0xff] }
 0x880   : > { %v2645_v22 = vpop.eup %2644 }
 0x881   : > { %v1849_v30 = vmul.f32 %v2645_v22, %v3925_v48  ;;  %v1848_v49 = vmul.f32 %v2645_v22, %v3919_v7  ;;  %v4319_v22 = vld [vmem:[#allocation28_spill] sm:$0xff] }
 0x882   : > { %v1744_v46 = vpop.xlane.xlu1 %1743 }
 0x883   : > { %v1899_v63 = vpack.c.bf16 %v1849_v30, %v1847_v3  ;;  %v1898_v29 = vpack.c.bf16 %v1848_v49, %v1846_v40  ;;  %2650 = vrcp.f32 %v1744_v46  ;;  %v4320_v3 = vld [vmem:[#allocation41_spill] sm:$0xff] }
 0x885   : > { %1930 = vmatprep.subr.bf16.mxu0 %v1899_v63  ;;  %v1747_v45 = vpop.xlane.xlu0 %1746  ;;  %v2647_v44 = vpop.eup %2646 }
 0x886   : > { %2652 = vrcp.f32 %v1747_v45  ;;  %1931 = vmatpush1.bf16.msra.mxu0 %v1898_v29  ;;  %v1851_v17 = vmul.f32 %v2647_v44, %v3933_v42  ;;  %v1850_v48 = vmul.f32 %v2647_v44, %v3931_v31  ;;  %v4321_v45 = vld [vmem:[#allocation33_spill] sm:$0xff] }
 0x888   : > { %v2649_v47 = vpop.eup %2648 }
 0x889   : > { %v1853_v36 = vmul.f32 %v2649_v47, %v3941_v53  ;;  %v1852_v26 = vmul.f32 %v2649_v47, %v3935_v11  ;;  %v4322_v47 = vld [vmem:[#allocation31_spill] sm:$0xff] }
 0x88a   : > { %v1750_v43 = vpop.xlane.xlu1 %1749 }
 0x88b   : > { %v1901_v7 = vpack.c.bf16 %v1853_v36, %v1851_v17  ;;  %v1900_v33 = vpack.c.bf16 %v1852_v26, %v1850_v48  ;;  %2654 = vrcp.f32 %v1750_v43  ;;  %v4323_v36 = vld [vmem:[#allocation32_spill] sm:$0xff] }
 0x88d   : > { %1932 = vmatprep.subr.bf16.mxu0 %v1901_v7  ;;  %v1753_v60 = vpop.xlane.xlu0 %1752  ;;  %v2651_v59 = vpop.eup %2650 }
 0x88e   : > { %2656 = vrcp.f32 %v1753_v60  ;;  %1933 = vmatpush1.bf16.msra.mxu0 %v1900_v33  ;;  %v1855_v51 = vmul.f32 %v2651_v59, %v3949_v50  ;;  %v1854_v53 = vmul.f32 %v2651_v59, %v3947_v5 }
 0x890   : > { %v2653_v55 = vpop.eup %2652 }
 0x891   : > { %v1857_v42 = vmul.f32 %v2653_v55, %v3957_v62  ;;  %v1856_v31 = vmul.f32 %v2653_v55, %v3951_v18 }
 0x892   : > { %v1756_v15 = vpop.xlane.xlu1 %1755 }
 0x893   : > { %v1903_v11 = vpack.c.bf16 %v1857_v42, %v1855_v51  ;;  %v1902_v61 = vpack.c.bf16 %v1856_v31, %v1854_v53  ;;  %2658 = vrcp.f32 %v1756_v15 }
 0x895   : > { %1934 = vmatprep.subr.bf16.mxu0 %v1903_v11  ;;  %v1759_v0 = vpop.xlane.xlu0 %1758  ;;  %v2655_v23 = vpop.eup %2654 }
 0x896   : > { %2660 = vrcp.f32 %v1759_v0  ;;  %1935 = vmatpush1.bf16.msra.mxu0 %v1902_v61  ;;  %v1859_v2 = vmul.f32 %v2655_v23, %v3965_v54  ;;  %v1858_v62 = vmul.f32 %v2655_v23, %v3963_v14 }
 0x898   : > { %v2657_v35 = vpop.eup %2656 }
 0x899   : > { %v1861_v50 = vmul.f32 %v2657_v35, %v3973_v4  ;;  %v1860_v5 = vmul.f32 %v2657_v35, %v3967_v24  ;;  %v4324_v35 = vld [vmem:[#allocation27_spill] sm:$0xff] }
 0x89a   : > { %v1762_v20 = vpop.xlane.xlu1 %1761 }
 0x89b   : > { %v1905_v18 = vpack.c.bf16 %v1861_v50, %v1859_v2  ;;  %v1904_v6 = vpack.c.bf16 %v1860_v5, %v1858_v62  ;;  %2662 = vrcp.f32 %v1762_v20 }
 0x89d   : > { %1936 = vmatprep.subr.bf16.mxu0 %v1905_v18  ;;  %v1765_v21 = vpop.xlane.xlu0 %1764  ;;  %v2659_v38 = vpop.eup %2658 }
 0x89e   : > { %2664 = vrcp.f32 %v1765_v21  ;;  %1937 = vmatpush1.bf16.msra.mxu0 %v1904_v6  ;;  %v1863_v25 = vmul.f32 %v2659_v38, %v3981_v32  ;;  %v1862_v4 = vmul.f32 %v2659_v38, %v3979_v37 }
 0x8a0   : > { %v2661_v58 = vpop.eup %2660 }
 0x8a1   : > { %v1865_v54 = vmul.f32 %v2661_v58, %v3989_v1  ;;  %v1864_v14 = vmul.f32 %v2661_v58, %v3983_v10  ;;  %v4328_v58 = vld [vmem:[#allocation38_spill] sm:$0xff] }
 0x8a2   : > { %v1768_v19 = vpop.xlane.xlu1 %1767 }
 0x8a3   : > { %v1907_v24 = vpack.c.bf16 %v1865_v54, %v1863_v25  ;;  %v1906_v34 = vpack.c.bf16 %v1864_v14, %v1862_v4  ;;  %2666 = vrcp.f32 %v1768_v19  ;;  %v4329_v54 = vld [vmem:[#allocation40_spill] sm:$0xff]  ;;  %v4330_v14 = vld [vmem:[#allocation37_spill] sm:$0xff]  ;;  %v4331_v19 = vld [vmem:[#allocation39_spill] sm:$0xff] }
 0x8a5   : > { %1938 = vmatprep.subr.bf16.mxu0 %v1907_v24  ;;  %v1771_v41 = vpop.xlane.xlu0 %1770  ;;  %v2663_v28 = vpop.eup %2662 }
 0x8a6   : > { %2668 = vrcp.f32 %v1771_v41  ;;  %1939 = vmatpush1.bf16.msra.mxu0 %v1906_v34  ;;  %v1867_v13 = vmul.f32 %v2663_v28, %v4317_v27  ;;  %v1866_v1 = vmul.f32 %v2663_v28, %v4319_v22  ;;  %v4332_v34 = vld [vmem:[#allocation26_spill] sm:$0xff] }
 0x8a8   : > { %v2665_v9 = vpop.eup %2664 }
 0x8a9   : > { %v1869_v32 = vmul.f32 %v2665_v9, %v4318_v56  ;;  %v1868_v37 = vmul.f32 %v2665_v9, %v4320_v3  ;;  %v3021_v56 = vmov 6  }
 0x8aa   : > { %v1774_v30 = vpop.xlane.xlu1 %1773  ;;  %2480 = vset.pattern.permute.xlu0 %v3021_v56 }
 0x8ab   : > { %v1909_v10 = vpack.c.bf16 %v1869_v32, %v1867_v13  ;;  %v1908_v40 = vpack.c.bf16 %v1868_v37, %v1866_v1  ;;  %2670 = vrcp.f32 %v1774_v30  ;;  %v4333_v13 = vmov 0   ;;  %v4334_v32 = vld [vmem:[#allocation42_spill] sm:$0xff] }
 0x8ac   : > { %1962 = vperm.xlu0 %2480, %v4334_v32  }
 0x8ad   : > { %1940 = vmatprep.subr.bf16.mxu0 %v1909_v10  ;;  %v1777_v49 = vpop.xlane.xlu0 %1776  ;;  %v2667_v46 = vpop.eup %2666 }
 0x8ae   : > { %2672 = vrcp.f32 %v1777_v49  ;;  %1941 = vmatpush1.bf16.msra.mxu0 %v1908_v40  ;;  %v1871_v29 = vmul.f32 %v2667_v46, %v4013_v39  ;;  %v1870_v17 = vmul.f32 %v2667_v46, %v4322_v47  ;;  %v474_v49 = vld [vmem:[#allocation14] sm:$0x3] }
 0x8b0   : > { %v2669_v63 = vpop.eup %2668 }
 0x8b1   : > { %v1873_v44 = vmul.f32 %v2669_v63, %v4321_v45  ;;  %v1872_v48 = vmul.f32 %v2669_v63, %v4323_v36 }
 0x8b2   : > { %v1780_v26 = vpop.xlane.xlu1 %1779 }
 0x8b3   : > { %2674 = vrcp.f32 %v1780_v26  ;;  %v1911_v43 = vpack.c.bf16 %v1873_v44, %v1871_v29  ;;  %v1910_v7 = vpack.c.bf16 %v1872_v48, %v1870_v17  ;;  %v4335_v17 = vld [vmem:[#allocation24_spill] sm:$0xff]  ;;  %v4336_v26 = vld [vmem:[#allocation25_spill] sm:$0xff] }
 0x8b4   : > { %v1783_v33 = vpop.xlane.xlu0 %1782 }
 0x8b5   : > { %1942 = vmatprep.subr.bf16.mxu0 %v1911_v43  ;;  %2676 = vrcp.f32 %v1783_v33  ;;  %v2671_v60 = vpop.eup %2670 }
 0x8b6   : > { %1943 = vmatpush1.bf16.msra.mxu0 %v1910_v7  ;;  %v1875_v55 = vmul.f32 %v2671_v60, %v4029_v12  ;;  %v1874_v51 = vmul.f32 %v2671_v60, %v4027_v57  ;;  %v4326_v57 = vld [vmem:[#allocation34_spill] sm:$0xff] }
 0x8b8   : > { %v2673_v59 = vpop.eup %2672 }
 0x8b9   : > { %v1877_v39 = vmul.f32 %v2673_v59, %v4037_v8  ;;  %v1876_v42 = vmul.f32 %v2673_v59, %v4031_v52  ;;  %v4325_v8 = vld [vmem:[#allocation36_spill] sm:$0xff]  ;;  %v4327_v52 = vld [vmem:[#allocation35_spill] sm:$0xff] }
 0x8ba   : > { %v1786_v53 = vpop.xlane.xlu1 %1785 }
 0x8bb   : > { %2678 = vrcp.f32 %v1786_v53  ;;  %v1913_v31 = vpack.c.bf16 %v1877_v39, %v1875_v55  ;;  %v1912_v15 = vpack.c.bf16 %v1876_v42, %v1874_v51 }
 0x8bc   : > { %v1789_v11 = vpop.xlane.xlu0 %1788 }
 0x8bd   : > { %v2675_v61 = vpop.eup %2674  ;;  %1944 = vmatprep.subr.bf16.mxu0 %v1913_v31  ;;  %2680 = vrcp.f32 %v1789_v11 }
 0x8be   : > { %1945 = vmatpush1.bf16.msra.mxu0 %v1912_v15  ;;  %v1115_v0 = vpop.permute.xlu1 %1114  ;;  %v1879_v12 = vmul.f32 %v2675_v61, %v4045_v16  ;;  %v1878_v62 = vmul.f32 %v2675_v61, %v4326_v57 }
 0x8bf   : > { %v2677_v23 = vpop.eup %2676  ;;  %v1118_v2 = vadd.f32 %v1115_v0, %v4324_v35  ;;  %v1117_v41 = vadd.f32 %v1115_v0, %v4332_v34 }
 0x8c0   : > { %v1881_v50 = vmul.f32 %v2677_v23, %v4325_v8  ;;  %v1880_v5 = vmul.f32 %v2677_v23, %v4327_v52 }
 0x8c1   : > { %v1120_v20 = vpack.c.bf16 %v1118_v2, %v1118_v2  ;;  %v1119_v27 = vpack.c.bf16 %v1117_v41, %v1117_v41 }
 0x8c2   : > { %v1915_v18 = vpack.c.bf16 %v1881_v50, %v1879_v12  ;;  %v1914_v6 = vpack.c.bf16 %v1880_v5, %v1878_v62 }
 0x8c3   : > { %1950 = vmatprep.mubr.bf16.mxu0 %v1120_v20 }
 0x8c4   : > { %1946 = vmatprep.subr.bf16.mxu0 %v1915_v18 }
 0x8c5   : > { %v2679_v21 = vpop.eup %2678  ;;  %1947 = vmatpush1.bf16.msra.mxu0 %v1914_v6 }
 0x8c6   : > { %v1883_v25 = vmul.f32 %v2679_v21, %v4328_v58  ;;  %v1882_v16 = vmul.f32 %v2679_v21, %v4330_v14 }
 0x8c7   : > { %v2681_v38 = vpop.eup %2680 }
 0x8c8   : > { %v1885_v4 = vmul.f32 %v2681_v38, %v4329_v54  ;;  %v1884_v24 = vmul.f32 %v2681_v38, %v4331_v19 }
 0x8ca   : > { %v1917_v28 = vpack.c.bf16 %v1885_v4, %v1883_v25  ;;  %v1916_v9 = vpack.c.bf16 %v1884_v24, %v1882_v16 }
 0x8cc   : > { %1948 = vmatprep.subr.bf16.mxu0 %v1917_v28 }
 0x8cd   : > { %1949 = vmatpush1.bf16.msra.mxu0 %v1916_v9 }
 0x8d0   : > { %1951 = vmatmul.mubr.bf16.vlgmr.msra.gmra.mrb[16].mxu0 %v1119_v27 }
 0x8d1   : > { %2006 = vmatprep.mubr.bf16.mxu0 %v4333_v13 }
 0x92b   : > { %v1963_v46 = vpop.permute.xlu0 %1962 }
 0x9a3   : > { %v1952_v22 = vpop.f32.mrb[16].mxu0 }
 0x9a4   : > { %v1959_v1 = vpack.c.bf16 %v1952_v22, %v1952_v22  ;;  %v1954_v3 = vpop.f32.mrb[17].mxu0 }
 0x9a5   : > { %v1960_v37 = vpack.c.bf16 %v1954_v3, %v1954_v3  ;;  %v1956_v30 = vpop.f32.mrb[18].mxu0 }
 0x9a6   : > { %v1969_v10 = vsel %vm884_vm12, %v1959_v1, 0  ;;  %v1957_v40 = vpop.f32.mrb[19].mxu0 }
 0x9a7   : > { %2237 = vmatprep.subr.msk.bf16.mxu0 %vm884_vm12, %v1960_v37 }
 0x9a8   : > { %1975 = vmatpush1.bf16.msra.mxu0 %v1969_v10 }
 0x9ab   : > { %2238 = vmatmul.mubr.msk.bf16.vlgmr.msra.gmra.mrb[20].mxu0 %vm1041_vm0, %v474_v49 }
 0xa7e   : > { %v2008_v63 = vpop.f32.mrb[20].mxu0 }
 0xa7f   : > { %v2009_v29 = vadd.f32 %v2008_v63, %v1963_v46  ;;  %v2010_v45 = vpop.f32.mrb[21].mxu0 }
 0xa80   : > { %v2011_v44 = vadd.f32 %v2010_v45, %v1963_v46  ;;  %v2012_v47 = vpop.f32.mrb[22].mxu0 }
 0xa81   : > { %v2015_v36 = vadd.f32 %v2009_v29, %v4335_v17  ;;  %v2013_v48 = vpop.f32.mrb[23].mxu0 }
 0xa82   : > { %v2016_v43 = vadd.f32 %v2011_v44, %v4336_v26 }
 0xa84   : > { %v2019_v7 = vcombine.low %v2015_v36, %v2016_v43 }
 0xa86   : > { %2021 = vst [vmem:[%s435_s14] sm:$0xff] %v2019_v7 }
 0xa87   : > { %2924 = shalt.err (!%p2921_p11)
}
 0xa88   : > { %s2925_s4 = scalar_lea.hbm %s4148_s0, 128  ;;  %s2929_s18 = scalar_lea.hbm %s4200_s8, 256 }
 0xa89   : > { %p2926_p9 = scmp.ne.s32.totalorder %s4148_s0, %s2925_s4  ;;  %p2930_p1 = scmp.lt.u32.totalorder %s4148_s0, %s4200_s8 }
 0xa8a   : > { %p2931_p3 = scmp.lt.u32.totalorder %s2929_s18, %s2925_s4  ;;  %p2933_p10 = scmp.lt.u32.totalorder %s2925_s4, %s4148_s0 }
 0xa8b   : > { %p2927_p12 = pnand %p2926_p9, %p4337_p4 }
 0xa8c   : > { %p2932_p2 = por %p2931_p3, %p2930_p1 }
 0xa8d   : > { %p2928_p13 = pneg %p2927_p12 }
 0xa8e   : > { %p2934_p5 = por %p2933_p10, %p2932_p2 }
 0xa90   : > { %p2935_p7 = pnand %p2934_p5, %p2928_p13 }
 0xa92   : > { %2938 = shalt.err (!%p2935_p7)
}
 0xa93   : > { %2274 = dma.vmem_to_hbm [thread:$0]  (%p4337_p4), %s4150_s3, 128, %s4148_s0, %s2023_s12  }
 0xa94 PF: > { %s2049_s13 = sand.u32 1, %s2985_s27   ;;  %p4338_p0 = scmp.ne.s32.totalorder %s4250_s21, 0 }
 0xa95   : > { %p4339_p8 = scmp.ge.s32.totalorder %s2997_s30, 2  ;;  %s2050_s26 = scalar_lea.sflag [#allocation4], %s2049_s13 }
 0xa97   : > { %p2303_p6 = pnand %p4339_p8, %p4338_p0 }
 0xa99   : > { %2980 = dma.done.wait (!%p2303_p6), %s2050_s26, 128  }
 0xa9a   : > { %2982 = vsyncadd (!%p2303_p6), %s2050_s26, 4294967168  ;;  %p27_p11 = scmp.ge.s32.totalorder %s3247_s17, 4   ;;  %s4340_s27 = smov %s2989_s28 }
 0xa9b   : > { %s4341_s28 = smov %s2993_s29  ;;  %s4342_s29 = smov %s3258_s9 }
 0xa9c   : > { %s4343_s30 = smov %s3247_s17  ;;  %29 = sbr.rel (!%p27_p11) target bundleno = 15 (0xf), region = 134 }
 0xaa3   :  { %2055 = vsyncpa [#allocation3], 1 }
 0xaa4   :  { %2057 = vsyncpa [#allocation3 + $0x1], 1 }
 0xaa5   :  { %2058 = vsyncpa [#allocation6], 1 }
 0xaa6   :  { %2060 = vsyncpa [#allocation6 + $0x1], 1 }
 0xaa7   :  { %2061 = vsyncpa [#allocation9], 1 }
 0xaa8   :  { %2062 = vsyncpa [#allocation12], 1 }
 0xaa9   :  { %2063 = vsyncpa [#allocation15], 1 }
 0xaaa   :  { %2064 = vsyncpa [#allocation4], 1 }
 0xaab   :  { %2066 = vsyncpa [#allocation4 + $0x1], 1 }

</bundles_post_ra>
